<compile_context>
chip_gen: v7x
topology: tpu7x:2x2x1
jax: 0.10.0
libtpu: 0.0.40
codegen_flags: <defaults>
</compile_context>

<pallas_src>
import math
import numpy as np
import jax
import jax.numpy as jnp
from jax import lax
from jax.experimental import pallas as pl
from jax.experimental.pallas import tpu as pltpu

# small, TPU-friendly shapes consistent with the module
B, S, DIN, E, Q = 2, 8, 128, 256, 8          # batch, seq, input_dim, output_dim, num_queries
NUM_HEADS = E // 128                          # module sets num_heads = output_dim // 128
HEAD_DIM = E // NUM_HEADS                     # = 128
EPS = 1e-6
NUM_SMALL = 5                                 # packed (1,E) params: lnkv_g, lnkv_b, bo, lnp_g, lnp_b


def sinusoids(max_length, embed_dim, max_timescale=10000):
    """Same as the PyTorch helper (sin | cos concat along feature dim)."""
    assert embed_dim % 2 == 0
    log_ts = np.log(max_timescale) / (embed_dim // 2 - 1)
    inv = np.exp(-log_ts * np.arange(embed_dim // 2))
    scaled = np.arange(max_length)[:, None] * inv[None, :]
    return jnp.asarray(
        np.concatenate([np.sin(scaled), np.cos(scaled)], axis=1), jnp.float32)


def _ln(x, g, b):
    mu = jnp.mean(x, axis=-1, keepdims=True)
    var = jnp.mean((x - mu) ** 2, axis=-1, keepdims=True)
    return (x - mu) * lax.rsqrt(var + EPS) * g + b


def adaptor_kernel(x_ref, wkv_ref, qpre_ref, wkvin_ref, bkvin_ref,
                   wo_ref, proj_ref, smallp_ref, o_ref):
    bf16 = jnp.bfloat16
    # one batch element per grid step; kernel sees x as (S, DIN) bf16
    # kv_proj + ln_kv
    kv = jnp.dot(x_ref[...], wkv_ref[...], preferred_element_type=jnp.float32)   # (S, E) f32
    kv = _ln(kv, smallp_ref[0:1, :], smallp_ref[1:2, :])

    # fused K|V in-projection; kpos is pre-folded into the K bias, V has no pos-emb
    kvp = jnp.dot(kv.astype(bf16), wkvin_ref[...],
                  preferred_element_type=jnp.float32) + bkvin_ref[...]            # (S, 2E) f32
    kp = kvp[:, :E].astype(bf16)                                                  # (S, E)
    vp = kvp[:, E:].astype(bf16)                                                  # (S, E)
    qp = qpre_ref[...]                                                            # (Q, E) bf16 (precomputed)

    scale = 1.0 / math.sqrt(HEAD_DIM)
    out = jnp.zeros((Q, E), jnp.float32)
    for h in range(NUM_HEADS):                       # static unroll over heads
        lo = h * HEAD_DIM
        qh = qp[:, lo:lo + HEAD_DIM]                 # (Q, HD) bf16
        kh = kp[:, lo:lo + HEAD_DIM]                 # (S, HD) bf16
        vh = vp[:, lo:lo + HEAD_DIM]                 # (S, HD) bf16
        # scores = qh @ kh.T (contract over head_dim, no explicit transpose)
        s = lax.dot_general(qh, kh, (((1,), (1,)), ((), ())),
                            preferred_element_type=jnp.float32) * scale          # (Q, S) f32
        m = jnp.max(s, axis=-1, keepdims=True)
        p = jnp.exp(s - m)
        p = p * pl.reciprocal(jnp.sum(p, axis=-1, keepdims=True), approx=True)
        head = jnp.dot(p.astype(bf16), vh, preferred_element_type=jnp.float32)    # (Q, HD)
        # accumulate straight into the out-projection (no lane concatenate)
        out = out + jnp.dot(head.astype(bf16), wo_ref[lo:lo + HEAD_DIM, :],
                            preferred_element_type=jnp.float32)                   # (Q, E)

    out = out + smallp_ref[2:3, :]                                                # + bo
    out = _ln(out, smallp_ref[3:4, :], smallp_ref[4:5, :])                        # ln_post
    o_ref[...] = jnp.dot(out.astype(bf16), proj_ref[...],
                         preferred_element_type=jnp.float32)                      # @ proj


def adaptor_forward(x, params):
    (wkv, query, qpos, kpos, lnq_g, lnq_b, lnkv_g, lnkv_b,
     wq, bq, wk, bk, wv, bv, wo, bo, lnp_g, lnp_b, proj) = params

    # ---- batch-independent precompute (plain JAX f32, runs once, not per grid step) ----
    q_pre = (_ln(query, lnq_g, lnq_b) + qpos) @ wq + bq              # (Q, E)  hoisted query path
    bk_fused = kpos @ wk + bk                                        # (S, E)  kpos folded into K bias
    w_kv_in = jnp.concatenate([wk, wv], axis=1)                      # (E, 2E) fused K|V weight
    b_kv_in = jnp.concatenate(
        [bk_fused, jnp.broadcast_to(bv, (S, E))], axis=1)            # (S, 2E) fused K|V bias
    smallp = jnp.concatenate([lnkv_g, lnkv_b, bo, lnp_g, lnp_b], axis=0)   # (5, E)

    bf16 = jnp.bfloat16
    inputs = (x.astype(bf16), wkv.astype(bf16), q_pre.astype(bf16),
              w_kv_in.astype(bf16), b_kv_in, wo.astype(bf16), proj.astype(bf16),
              smallp)

    full = lambda shape: pl.BlockSpec(shape, lambda b: (0, 0))
    in_specs = [
        pl.BlockSpec((None, S, DIN), lambda b: (b, 0, 0)),  # x (batch dim squeezed)
        full((DIN, E)),                                     # kv_proj weight
        full((Q, E)),                                       # precomputed query projection
        full((E, 2 * E)),                                   # fused Wk|Wv
        full((S, 2 * E)),                                   # fused K|V bias (incl. kpos)
        full((E, E)),                                       # out_proj weight
        full((E, E)),                                       # final proj
        full((NUM_SMALL, E)),                               # packed LN gammas/betas + bo
    ]
    out_spec = pl.BlockSpec((None, Q, E), lambda b: (b, 0, 0))
    return pl.pallas_call(
        adaptor_kernel,
        out_shape=jax.ShapeDtypeStruct((B, Q, E), jnp.float32),
        grid=(B,),
        in_specs=in_specs,
        out_specs=out_spec,
        compiler_params=pltpu.CompilerParams(dimension_semantics=("parallel",)),
    )(*inputs)


def reference_forward(x, params):
    """Pure f32 reference that follows the PyTorch module structure."""
    (wkv, query, qpos, kpos, lnq_g, lnq_b, lnkv_g, lnkv_b,
     wq, bq, wk, bk, wv, bv, wo, bo, lnp_g, lnp_b, proj) = params
    kv = _ln(x @ wkv, lnkv_g, lnkv_b)                       # (B,S,E)
    k = kv + kpos[None]
    v = kv
    qn = _ln(query, lnq_g, lnq_b) + qpos                    # (Q,E)
    qp = qn @ wq + bq                                       # (Q,E)
    kp = k @ wk + bk                                        # (B,S,E)
    vp = v @ wv + bv
    scale = 1.0 / math.sqrt(HEAD_DIM)
    qh = qp.reshape(Q, NUM_HEADS, HEAD_DIM).transpose(1, 0, 2)          # (H,Q,D)
    kh = kp.reshape(B, S, NUM_HEADS, HEAD_DIM).transpose(0, 2, 1, 3)    # (B,H,S,D)
    vh = vp.reshape(B, S, NUM_HEADS, HEAD_DIM).transpose(0, 2, 1, 3)
    s = jnp.einsum('hqd,bhsd->bhqs', qh, kh) * scale
    p = jax.nn.softmax(s, axis=-1)
    o = jnp.einsum('bhqs,bhsd->bhqd', p, vh).transpose(0, 2, 1, 3).reshape(B, Q, E)
    o = o @ wo + bo
    o = _ln(o, lnp_g, lnp_b)
    return o @ proj


def make_params(key):
    ks = jax.random.split(key, 8)
    nrm = lambda k, shape, std=0.02: (std * jax.random.normal(k, shape)).astype(jnp.float32)
    wkv = nrm(ks[0], (DIN, E))
    query = nrm(ks[1], (Q, E))
    qpos = sinusoids(Q, E)
    kpos = sinusoids(S, E)
    ones = jnp.ones((1, E), jnp.float32)
    zeros = jnp.zeros((1, E), jnp.float32)
    wq = nrm(ks[2], (E, E)); wk = nrm(ks[3], (E, E)); wv = nrm(ks[4], (E, E))
    wo = nrm(ks[5], (E, E))
    bq = bk = bv = bo = zeros
    proj = (E ** -0.5) * jax.random.normal(ks[6], (E, E)).astype(jnp.float32)
    return (wkv, query, qpos, kpos, ones, zeros, ones, zeros,
            wq, bq, wk, bk, wv, bv, wo, bo, ones, zeros, proj)


if __name__ == "__main__":
    key = jax.random.PRNGKey(0)
    kx, kp = jax.random.split(key)
    x = jax.random.normal(kx, (B, S, DIN), dtype=jnp.float32)
    params = make_params(kp)

    out = adaptor_forward(x, params)
    out = jax.block_until_ready(out)

    ref = jax.block_until_ready(reference_forward(x, params))
    assert out.shape == (B, Q, E)
    # Tolerance loosened vs. the pure-f32 reference because the kernel feeds the
    # MXU bf16 operands (f32 accumulation); measured error is well inside 3e-2.
    np.testing.assert_allclose(np.asarray(out), np.asarray(ref), rtol=3e-2, atol=3e-2)

    print("KERNEL_OK")
</pallas_src>

<mosaic_0001>
module attributes {stable_mosaic.version = 11 : i64} {
  func.func @adaptor_kernel(%arg0: i32, %arg1: memref<1x8x128xbf16, #tpu.memory_space<vmem>>, %arg2: memref<128x256xbf16, #tpu.memory_space<vmem>>, %arg3: memref<8x256xbf16, #tpu.memory_space<vmem>>, %arg4: memref<256x512xbf16, #tpu.memory_space<vmem>>, %arg5: memref<8x512xf32, #tpu.memory_space<vmem>>, %arg6: memref<256x256xbf16, #tpu.memory_space<vmem>>, %arg7: memref<256x256xbf16, #tpu.memory_space<vmem>>, %arg8: memref<5x256xf32, #tpu.memory_space<vmem>>, %arg9: memref<1x8x256xf32, #tpu.memory_space<vmem>>) attributes {dimension_semantics = [#tpu.dimension_semantics<parallel>], iteration_bounds = array<i64: 2>, scalar_prefetch = 0 : i64, scratch_operands = 0 : i64, tpu.core_type = #tpu.core_type<tc>, window_params = [{transform_indices = @transform_0, window_bounds = array<i64: 1, 8, 128>}, {pipeline_mode = #tpu.pipeline_mode<synchronous>, transform_indices = @transform_1, window_bounds = array<i64: 128, 256>}, {pipeline_mode = #tpu.pipeline_mode<synchronous>, transform_indices = @transform_2, window_bounds = array<i64: 8, 256>}, {pipeline_mode = #tpu.pipeline_mode<synchronous>, transform_indices = @transform_3, window_bounds = array<i64: 256, 512>}, {pipeline_mode = #tpu.pipeline_mode<synchronous>, transform_indices = @transform_4, window_bounds = array<i64: 8, 512>}, {pipeline_mode = #tpu.pipeline_mode<synchronous>, transform_indices = @transform_5, window_bounds = array<i64: 256, 256>}, {pipeline_mode = #tpu.pipeline_mode<synchronous>, transform_indices = @transform_6, window_bounds = array<i64: 256, 256>}, {pipeline_mode = #tpu.pipeline_mode<synchronous>, transform_indices = @transform_7, window_bounds = array<i64: 5, 256>}, {transform_indices = @transform_8, window_bounds = array<i64: 1, 8, 256>}]} {
    %c0 = arith.constant 0 : index
    %c0_0 = arith.constant 0 : index
    %c0_1 = arith.constant 0 : index
    %0 = vector.load %arg1[%c0, %c0_0, %c0_1] : memref<1x8x128xbf16, #tpu.memory_space<vmem>>, vector<1x8x128xbf16>
    %1 = vector.shape_cast %0 : vector<1x8x128xbf16> to vector<8x128xbf16>
    %c0_2 = arith.constant 0 : index
    %c0_3 = arith.constant 0 : index
    %2 = vector.load %arg2[%c0_2, %c0_3] : memref<128x256xbf16, #tpu.memory_space<vmem>>, vector<128x256xbf16>
    %cst = arith.constant dense<0.000000e+00> : vector<8x256xf32>
    %3 = tpu.matmul %1, %2, %cst {dimension_numbers = #tpu.dot_dimension_numbers<[1], [0], [0], [1], [0, 0, 1, 1], [], []>} : vector<8x128xbf16>, vector<128x256xbf16>, vector<8x256xf32> -> vector<8x256xf32>
    %c0_4 = arith.constant 0 : index
    %c0_5 = arith.constant 0 : index
    %4 = vector.load %arg8[%c0_4, %c0_5] : memref<5x256xf32, #tpu.memory_space<vmem>>, vector<1x256xf32>
    %c1 = arith.constant 1 : index
    %c0_6 = arith.constant 0 : index
    %5 = vector.load %arg8[%c1, %c0_6] : memref<5x256xf32, #tpu.memory_space<vmem>>, vector<1x256xf32>
    %cst_7 = arith.constant dense<0.000000e+00> : vector<8xf32>
    %6 = vector.multi_reduction <add>, %3, %cst_7 [1] : vector<8x256xf32> to vector<8xf32>
    %7 = vector.shape_cast %6 : vector<8xf32> to vector<8x1xf32>
    %cst_8 = arith.constant 2.560000e+02 : f32
    %8 = vector.broadcast %cst_8 : f32 to vector<8x1xf32>
    %9 = arith.divf %7, %8 : vector<8x1xf32>
    %10 = vector.broadcast %9 : vector<8x1xf32> to vector<8x256xf32>
    %11 = arith.subf %3, %10 : vector<8x256xf32>
    %12 = arith.mulf %11, %11 : vector<8x256xf32>
    %cst_9 = arith.constant dense<0.000000e+00> : vector<8xf32>
    %13 = vector.multi_reduction <add>, %12, %cst_9 [1] : vector<8x256xf32> to vector<8xf32>
    %14 = vector.shape_cast %13 : vector<8xf32> to vector<8x1xf32>
    %cst_10 = arith.constant 2.560000e+02 : f32
    %15 = vector.broadcast %cst_10 : f32 to vector<8x1xf32>
    %16 = arith.divf %14, %15 : vector<8x1xf32>
    %17 = vector.broadcast %9 : vector<8x1xf32> to vector<8x256xf32>
    %18 = arith.subf %3, %17 : vector<8x256xf32>
    %cst_11 = arith.constant 9.99999997E-7 : f32
    %19 = vector.broadcast %cst_11 : f32 to vector<8x1xf32>
    %20 = arith.addf %16, %19 : vector<8x1xf32>
    %21 = math.rsqrt %20 : vector<8x1xf32>
    %22 = vector.broadcast %21 : vector<8x1xf32> to vector<8x256xf32>
    %23 = arith.mulf %18, %22 : vector<8x256xf32>
    %24 = vector.broadcast %4 : vector<1x256xf32> to vector<8x256xf32>
    %25 = arith.mulf %23, %24 : vector<8x256xf32>
    %26 = vector.broadcast %5 : vector<1x256xf32> to vector<8x256xf32>
    %27 = arith.addf %25, %26 : vector<8x256xf32>
    %28 = arith.truncf %27 : vector<8x256xf32> to vector<8x256xbf16>
    %c0_12 = arith.constant 0 : index
    %c0_13 = arith.constant 0 : index
    %29 = vector.load %arg4[%c0_12, %c0_13] : memref<256x512xbf16, #tpu.memory_space<vmem>>, vector<256x512xbf16>
    %cst_14 = arith.constant dense<0.000000e+00> : vector<8x512xf32>
    %30 = tpu.matmul %28, %29, %cst_14 {dimension_numbers = #tpu.dot_dimension_numbers<[1], [0], [0], [1], [0, 0, 1, 1], [], []>} : vector<8x256xbf16>, vector<256x512xbf16>, vector<8x512xf32> -> vector<8x512xf32>
    %c0_15 = arith.constant 0 : index
    %c0_16 = arith.constant 0 : index
    %31 = vector.load %arg5[%c0_15, %c0_16] : memref<8x512xf32, #tpu.memory_space<vmem>>, vector<8x512xf32>
    %32 = arith.addf %30, %31 : vector<8x512xf32>
    %33 = vector.extract_strided_slice %32 {offsets = [0, 0], sizes = [8, 256], strides = [1, 1]} : vector<8x512xf32> to vector<8x256xf32>
    %34 = arith.truncf %33 : vector<8x256xf32> to vector<8x256xbf16>
    %35 = vector.extract_strided_slice %32 {offsets = [0, 256], sizes = [8, 256], strides = [1, 1]} : vector<8x512xf32> to vector<8x256xf32>
    %36 = arith.truncf %35 : vector<8x256xf32> to vector<8x256xbf16>
    %c0_17 = arith.constant 0 : index
    %c0_18 = arith.constant 0 : index
    %37 = vector.load %arg3[%c0_17, %c0_18] : memref<8x256xbf16, #tpu.memory_space<vmem>>, vector<8x256xbf16>
    %cst_19 = arith.constant 0.000000e+00 : f32
    %38 = vector.broadcast %cst_19 : f32 to vector<8x256xf32>
    %39 = vector.extract_strided_slice %37 {offsets = [0, 0], sizes = [8, 128], strides = [1, 1]} : vector<8x256xbf16> to vector<8x128xbf16>
    %40 = vector.extract_strided_slice %34 {offsets = [0, 0], sizes = [8, 128], strides = [1, 1]} : vector<8x256xbf16> to vector<8x128xbf16>
    %41 = vector.extract_strided_slice %36 {offsets = [0, 0], sizes = [8, 128], strides = [1, 1]} : vector<8x256xbf16> to vector<8x128xbf16>
    %cst_20 = arith.constant dense<0.000000e+00> : vector<8x8xf32>
    %42 = tpu.matmul %39, %40, %cst_20 {dimension_numbers = #tpu.dot_dimension_numbers<[1], [1], [0], [0], [0, 0, 1, 0], [], []>} : vector<8x128xbf16>, vector<8x128xbf16>, vector<8x8xf32> -> vector<8x8xf32>
    %cst_21 = arith.constant 0.0883883461 : f32
    %43 = vector.broadcast %cst_21 : f32 to vector<8x8xf32>
    %44 = arith.mulf %42, %43 : vector<8x8xf32>
    %cst_22 = arith.constant dense<0xFF800000> : vector<8xf32>
    %45 = vector.multi_reduction <maximumf>, %44, %cst_22 [1] : vector<8x8xf32> to vector<8xf32>
    %46 = vector.shape_cast %45 : vector<8xf32> to vector<8x1xf32>
    %47 = vector.broadcast %46 : vector<8x1xf32> to vector<8x8xf32>
    %48 = arith.subf %44, %47 : vector<8x8xf32>
    %49 = math.exp %48 : vector<8x8xf32>
    %cst_23 = arith.constant dense<0.000000e+00> : vector<8xf32>
    %50 = vector.multi_reduction <add>, %49, %cst_23 [1] : vector<8x8xf32> to vector<8xf32>
    %51 = vector.shape_cast %50 : vector<8xf32> to vector<8x1xf32>
    %52 = tpu.reciprocal %51 {approx = true} : vector<8x1xf32> -> vector<8x1xf32>
    %53 = vector.broadcast %52 : vector<8x1xf32> to vector<8x8xf32>
    %54 = arith.mulf %49, %53 : vector<8x8xf32>
    %55 = arith.truncf %54 : vector<8x8xf32> to vector<8x8xbf16>
    %cst_24 = arith.constant dense<0.000000e+00> : vector<8x128xf32>
    %56 = tpu.matmul %55, %41, %cst_24 {dimension_numbers = #tpu.dot_dimension_numbers<[1], [0], [0], [1], [0, 0, 1, 1], [], []>} : vector<8x8xbf16>, vector<8x128xbf16>, vector<8x128xf32> -> vector<8x128xf32>
    %57 = arith.truncf %56 : vector<8x128xf32> to vector<8x128xbf16>
    %c0_25 = arith.constant 0 : index
    %c0_26 = arith.constant 0 : index
    %58 = vector.load %arg6[%c0_25, %c0_26] : memref<256x256xbf16, #tpu.memory_space<vmem>>, vector<128x256xbf16>
    %cst_27 = arith.constant dense<0.000000e+00> : vector<8x256xf32>
    %59 = tpu.matmul %57, %58, %cst_27 {dimension_numbers = #tpu.dot_dimension_numbers<[1], [0], [0], [1], [0, 0, 1, 1], [], []>} : vector<8x128xbf16>, vector<128x256xbf16>, vector<8x256xf32> -> vector<8x256xf32>
    %60 = arith.addf %38, %59 : vector<8x256xf32>
    %61 = vector.extract_strided_slice %37 {offsets = [0, 128], sizes = [8, 128], strides = [1, 1]} : vector<8x256xbf16> to vector<8x128xbf16>
    %62 = vector.extract_strided_slice %34 {offsets = [0, 128], sizes = [8, 128], strides = [1, 1]} : vector<8x256xbf16> to vector<8x128xbf16>
    %63 = vector.extract_strided_slice %36 {offsets = [0, 128], sizes = [8, 128], strides = [1, 1]} : vector<8x256xbf16> to vector<8x128xbf16>
    %cst_28 = arith.constant dense<0.000000e+00> : vector<8x8xf32>
    %64 = tpu.matmul %61, %62, %cst_28 {dimension_numbers = #tpu.dot_dimension_numbers<[1], [1], [0], [0], [0, 0, 1, 0], [], []>} : vector<8x128xbf16>, vector<8x128xbf16>, vector<8x8xf32> -> vector<8x8xf32>
    %cst_29 = arith.constant 0.0883883461 : f32
    %65 = vector.broadcast %cst_29 : f32 to vector<8x8xf32>
    %66 = arith.mulf %64, %65 : vector<8x8xf32>
    %cst_30 = arith.constant dense<0xFF800000> : vector<8xf32>
    %67 = vector.multi_reduction <maximumf>, %66, %cst_30 [1] : vector<8x8xf32> to vector<8xf32>
    %68 = vector.shape_cast %67 : vector<8xf32> to vector<8x1xf32>
    %69 = vector.broadcast %68 : vector<8x1xf32> to vector<8x8xf32>
    %70 = arith.subf %66, %69 : vector<8x8xf32>
    %71 = math.exp %70 : vector<8x8xf32>
    %cst_31 = arith.constant dense<0.000000e+00> : vector<8xf32>
    %72 = vector.multi_reduction <add>, %71, %cst_31 [1] : vector<8x8xf32> to vector<8xf32>
    %73 = vector.shape_cast %72 : vector<8xf32> to vector<8x1xf32>
    %74 = tpu.reciprocal %73 {approx = true} : vector<8x1xf32> -> vector<8x1xf32>
    %75 = vector.broadcast %74 : vector<8x1xf32> to vector<8x8xf32>
    %76 = arith.mulf %71, %75 : vector<8x8xf32>
    %77 = arith.truncf %76 : vector<8x8xf32> to vector<8x8xbf16>
    %cst_32 = arith.constant dense<0.000000e+00> : vector<8x128xf32>
    %78 = tpu.matmul %77, %63, %cst_32 {dimension_numbers = #tpu.dot_dimension_numbers<[1], [0], [0], [1], [0, 0, 1, 1], [], []>} : vector<8x8xbf16>, vector<8x128xbf16>, vector<8x128xf32> -> vector<8x128xf32>
    %79 = arith.truncf %78 : vector<8x128xf32> to vector<8x128xbf16>
    %c128 = arith.constant 128 : index
    %c0_33 = arith.constant 0 : index
    %80 = vector.load %arg6[%c128, %c0_33] : memref<256x256xbf16, #tpu.memory_space<vmem>>, vector<128x256xbf16>
    %cst_34 = arith.constant dense<0.000000e+00> : vector<8x256xf32>
    %81 = tpu.matmul %79, %80, %cst_34 {dimension_numbers = #tpu.dot_dimension_numbers<[1], [0], [0], [1], [0, 0, 1, 1], [], []>} : vector<8x128xbf16>, vector<128x256xbf16>, vector<8x256xf32> -> vector<8x256xf32>
    %82 = arith.addf %60, %81 : vector<8x256xf32>
    %c2 = arith.constant 2 : index
    %c0_35 = arith.constant 0 : index
    %83 = vector.load %arg8[%c2, %c0_35] : memref<5x256xf32, #tpu.memory_space<vmem>>, vector<1x256xf32>
    %84 = vector.broadcast %83 : vector<1x256xf32> to vector<8x256xf32>
    %85 = arith.addf %82, %84 : vector<8x256xf32>
    %c3 = arith.constant 3 : index
    %c0_36 = arith.constant 0 : index
    %86 = vector.load %arg8[%c3, %c0_36] : memref<5x256xf32, #tpu.memory_space<vmem>>, vector<1x256xf32>
    %c4 = arith.constant 4 : index
    %c0_37 = arith.constant 0 : index
    %87 = vector.load %arg8[%c4, %c0_37] : memref<5x256xf32, #tpu.memory_space<vmem>>, vector<1x256xf32>
    %cst_38 = arith.constant dense<0.000000e+00> : vector<8xf32>
    %88 = vector.multi_reduction <add>, %85, %cst_38 [1] : vector<8x256xf32> to vector<8xf32>
    %89 = vector.shape_cast %88 : vector<8xf32> to vector<8x1xf32>
    %cst_39 = arith.constant 2.560000e+02 : f32
    %90 = vector.broadcast %cst_39 : f32 to vector<8x1xf32>
    %91 = arith.divf %89, %90 : vector<8x1xf32>
    %92 = vector.broadcast %91 : vector<8x1xf32> to vector<8x256xf32>
    %93 = arith.subf %85, %92 : vector<8x256xf32>
    %94 = arith.mulf %93, %93 : vector<8x256xf32>
    %cst_40 = arith.constant dense<0.000000e+00> : vector<8xf32>
    %95 = vector.multi_reduction <add>, %94, %cst_40 [1] : vector<8x256xf32> to vector<8xf32>
    %96 = vector.shape_cast %95 : vector<8xf32> to vector<8x1xf32>
    %cst_41 = arith.constant 2.560000e+02 : f32
    %97 = vector.broadcast %cst_41 : f32 to vector<8x1xf32>
    %98 = arith.divf %96, %97 : vector<8x1xf32>
    %99 = vector.broadcast %91 : vector<8x1xf32> to vector<8x256xf32>
    %100 = arith.subf %85, %99 : vector<8x256xf32>
    %cst_42 = arith.constant 9.99999997E-7 : f32
    %101 = vector.broadcast %cst_42 : f32 to vector<8x1xf32>
    %102 = arith.addf %98, %101 : vector<8x1xf32>
    %103 = math.rsqrt %102 : vector<8x1xf32>
    %104 = vector.broadcast %103 : vector<8x1xf32> to vector<8x256xf32>
    %105 = arith.mulf %100, %104 : vector<8x256xf32>
    %106 = vector.broadcast %86 : vector<1x256xf32> to vector<8x256xf32>
    %107 = arith.mulf %105, %106 : vector<8x256xf32>
    %108 = vector.broadcast %87 : vector<1x256xf32> to vector<8x256xf32>
    %109 = arith.addf %107, %108 : vector<8x256xf32>
    %110 = arith.truncf %109 : vector<8x256xf32> to vector<8x256xbf16>
    %c0_43 = arith.constant 0 : index
    %c0_44 = arith.constant 0 : index
    %111 = vector.load %arg7[%c0_43, %c0_44] : memref<256x256xbf16, #tpu.memory_space<vmem>>, vector<256x256xbf16>
    %cst_45 = arith.constant dense<0.000000e+00> : vector<8x256xf32>
    %112 = tpu.matmul %110, %111, %cst_45 {dimension_numbers = #tpu.dot_dimension_numbers<[1], [0], [0], [1], [0, 0, 1, 1], [], []>} : vector<8x256xbf16>, vector<256x256xbf16>, vector<8x256xf32> -> vector<8x256xf32>
    %c0_46 = arith.constant 0 : index
    %c0_47 = arith.constant 0 : index
    %c0_48 = arith.constant 0 : index
    %113 = vector.load %arg9[%c0_46, %c0_47, %c0_48] : memref<1x8x256xf32, #tpu.memory_space<vmem>>, vector<1x8x256xf32>
    %114 = vector.shape_cast %113 : vector<1x8x256xf32> to vector<8x256xf32>
    %115 = vector.shape_cast %112 : vector<8x256xf32> to vector<1x8x256xf32>
    tpu.vector_store %arg9[%c0_46, %c0_47, %c0_48], %115 {strides = array<i32>} : memref<1x8x256xf32, #tpu.memory_space<vmem>>, vector<1x8x256xf32>,
    return
  }
  func.func @transform_0(%arg0: i32) -> (i32, i32, i32) {
    %c0_i32 = arith.constant 0 : i32
    %c0_i32_0 = arith.constant 0 : i32
    %c0_i32_1 = arith.constant 0 : i32
    return %arg0, %c0_i32, %c0_i32_0 : i32, i32, i32
  }
  func.func @transform_1(%arg0: i32) -> (i32, i32) {
    %c0_i32 = arith.constant 0 : i32
    %c0_i32_0 = arith.constant 0 : i32
    %c0_i32_1 = arith.constant 0 : i32
    return %c0_i32, %c0_i32_0 : i32, i32
  }
  func.func @transform_2(%arg0: i32) -> (i32, i32) {
    %c0_i32 = arith.constant 0 : i32
    %c0_i32_0 = arith.constant 0 : i32
    %c0_i32_1 = arith.constant 0 : i32
    return %c0_i32, %c0_i32_0 : i32, i32
  }
  func.func @transform_3(%arg0: i32) -> (i32, i32) {
    %c0_i32 = arith.constant 0 : i32
    %c0_i32_0 = arith.constant 0 : i32
    %c0_i32_1 = arith.constant 0 : i32
    return %c0_i32, %c0_i32_0 : i32, i32
  }
  func.func @transform_4(%arg0: i32) -> (i32, i32) {
    %c0_i32 = arith.constant 0 : i32
    %c0_i32_0 = arith.constant 0 : i32
    %c0_i32_1 = arith.constant 0 : i32
    return %c0_i32, %c0_i32_0 : i32, i32
  }
  func.func @transform_5(%arg0: i32) -> (i32, i32) {
    %c0_i32 = arith.constant 0 : i32
    %c0_i32_0 = arith.constant 0 : i32
    %c0_i32_1 = arith.constant 0 : i32
    return %c0_i32, %c0_i32_0 : i32, i32
  }
  func.func @transform_6(%arg0: i32) -> (i32, i32) {
    %c0_i32 = arith.constant 0 : i32
    %c0_i32_0 = arith.constant 0 : i32
    %c0_i32_1 = arith.constant 0 : i32
    return %c0_i32, %c0_i32_0 : i32, i32
  }
  func.func @transform_7(%arg0: i32) -> (i32, i32) {
    %c0_i32 = arith.constant 0 : i32
    %c0_i32_0 = arith.constant 0 : i32
    %c0_i32_1 = arith.constant 0 : i32
    return %c0_i32, %c0_i32_0 : i32, i32
  }
  func.func @transform_8(%arg0: i32) -> (i32, i32, i32) {
    %c0_i32 = arith.constant 0 : i32
    %c0_i32_0 = arith.constant 0 : i32
    %c0_i32_1 = arith.constant 0 : i32
    return %arg0, %c0_i32, %c0_i32_0 : i32, i32, i32
  }
}

</mosaic_0001>

<bundles_post_ra>
// kernel: tpu_custom_call.1
= control target key start
LH: loop header
LB: loop body
LE: loop exit
PB: predicated region body
PF: predicated region fallthrough
CT: control target
= control target key end

     0   :  { %s3269_s0 = inlined_call_operand.hbm [shape: bf16[2,8,128], index: 0, kind: input, shape index: {}]   ;;  %s3270_s1 = inlined_call_operand.hbm [shape: bf16[128,256], index: 1, kind: input, shape index: {}]   ;;  %s3271_s2 = inlined_call_operand.hbm [shape: bf16[8,256], index: 2, kind: input, shape index: {}]   ;;  %s3272_s3 = inlined_call_operand.hbm [shape: bf16[256,512], index: 3, kind: input, shape index: {}]   ;;  %s3273_s4 = inlined_call_operand.hbm [shape: f32[8,512], index: 4, kind: input, shape index: {}]   ;;  %s3274_s5 = inlined_call_operand.hbm [shape: bf16[256,256], index: 5, kind: input, shape index: {}]   ;;  %s3275_s6 = inlined_call_operand.hbm [shape: bf16[256,256], index: 6, kind: input, shape index: {}]   ;;  %s3276_s7 = inlined_call_operand.vmem [shape: f32[5,256], index: 7, kind: input, shape index: {}]   ;;  %s3277_s8 = inlined_call_operand.hbm [shape: f32[2,8,256], index: 8, kind: output, shape index: {}]  }
   0x1   :  { %3283 = sst [smem:[#allocation20_spill]] %s3270_s1 }
   0x2   :  { %13 = vsyncpa [#allocation3], 0 }
   0x3   :  { %15 = vsyncpa [#allocation3 + $0x1], 0 }
   0x4   :  { %16 = vsyncpa [#allocation6], 0 }
   0x5   :  { %17 = vsyncpa [#allocation9], 0 }
   0x6   :  { %18 = vsyncpa [#allocation12], 0 }
   0x7   :  { %19 = vsyncpa [#allocation4], 0 }
   0x8   :  { %21 = vsyncpa [#allocation4 + $0x1], 0  ;;  %s2876_s27 = smov 0   ;;  %s2878_s28 = smov 0  }
   0x9   :  { %s2880_s29 = smov 0   ;;  %s2882_s30 = smov 0  }
   0xa LB: > { %s2816_s9 = smov [#allocation5]   ;;  %s2897_s11 = sadd.s32 4294967295, %s2814_s30   ;;  %s2814_s30 = sphi %s2882_s30, %s3308_s30   ;;  %s2810_s29 = sphi %s2880_s29, %s3307_s29   ;;  %s2806_s28 = sphi %s2878_s28, %s3306_s28   ;;  %s2802_s27 = sphi %s2876_s27, %s3305_s27  }
   0xb   : > { %s243_s10 = sshll.u32 %s2816_s9, 4  ;;  %p1987_p0 = scmp.ge.s32.totalorder %s2814_s30, 1  ;;  %s2902_s10 = int_to_ptr.vmem [resolvable:$true] %s243_s10 }
   0xc   : > { %p3280_p1 = scmp.eq.s32.totalorder %s2897_s11, 0  ;;  %p231_p2 = scmp.lt.s32.totalorder %s2814_s30, 3 }
   0xd   : > { %s2817_s13 = smov [#allocation8]   ;;  %s2818_s16 = smov [#allocation11]  }
   0xe   : > { %p2904_p3 = pnand %p1987_p0, %p231_p2  ;;  %s267_s14 = sshll.u32 %s2817_s13, 4  ;;  %s2917_s14 = int_to_ptr.vmem [resolvable:$true] %s267_s14 }
   0xf   : > { %s2919_s17 = sshll.u32 %s2818_s16, 4  ;;  %s3286_s1 = sld [smem:[#allocation20_spill]]  ;;  %s292_s17 = int_to_ptr.vmem [resolvable:$true] %s2919_s17 }
  0x10   : > { %s3284_s12 = scalar_select %p2904_p3, 1, 0 }
  0x11   : > { %p2223_p5 = pneg %p2904_p3 }
  0x13   : > { %p2913_p6 = pnand %p2223_p5, %p3280_p1 }
  0x15   : > { %s2538_s20 = scalar_lea.hbm %s3286_s1, 2048  ;;  %p2929_p8 = pneg %p2913_p6 }
  0x16   : > { %p2539_p7 = scmp.ne.s32.totalorder %s3286_s1, %s2538_s20  ;;  %p2545_p11 = scmp.lt.u32.totalorder %s2538_s20, %s3286_s1 }
  0x18   : > { %p2541_p9 = pnand %p2929_p8, %p2539_p7 }
  0x1a   : > { %p2542_p10 = pneg %p2541_p9 }
  0x1c   : > { %p2547_p12 = pnand %p2545_p11, %p2542_p10 }
  0x1e   : > { %2550 = shalt.err (!%p2547_p12)
}
  0x1f   : > { %s2551_s26 = scalar_lea.vmem %s2902_s10, 2048  ;;  %p2559_p5 = scmp.lt.s32.totalorder %s2902_s10, %s2902_s10 }
  0x20   : > { %p2552_p13 = scmp.ne.s32.totalorder %s2902_s10, %s2551_s26  ;;  %p2560_p4 = scmp.lt.s32.totalorder %s2551_s26, %s2551_s26 }
  0x22   : > { %p2554_p0 = pnand %p2552_p13, %p2929_p8  ;;  %p2561_p7 = por %p2560_p4, %p2559_p5 }
  0x24   : > { %p2555_p2 = pneg %p2554_p0 }
  0x26   : > { %p2562_p9 = pnand %p2561_p7, %p2555_p2 }
  0x28   : > { %2565 = shalt.err (!%p2562_p9)
}
  0x29   : > { %s3278_s9 = smov 128   ;;  %s2820_s13 = smov 8  }
  0x2a   : > { %2226 = dma.hbm_to_vmem [thread:$0]  (!%p2913_p6), %s3286_s1, 2048, %s2902_s10, [#allocation6], %s3278_s9, %s3278_s9, %s2820_s13  }
  0x2b   : > { %s2566_s21 = scalar_lea.hbm %s3272_s3, 8192 }
  0x2c   : > { %p2567_p4 = scmp.ne.s32.totalorder %s3272_s3, %s2566_s21  ;;  %p2573_p12 = scmp.lt.u32.totalorder %s2566_s21, %s3272_s3 }
  0x2e   : > { %p2569_p10 = pnand %p2567_p4, %p2929_p8 }
  0x30   : > { %p2570_p11 = pneg %p2569_p10 }
  0x32   : > { %p2575_p13 = pnand %p2573_p12, %p2570_p11 }
  0x34   : > { %2578 = shalt.err (!%p2575_p13)
}
  0x35   : > { %s2579_s10 = scalar_lea.vmem %s2917_s14, 8192  ;;  %p2587_p7 = scmp.lt.s32.totalorder %s2917_s14, %s2917_s14 }
  0x36   : > { %p2580_p0 = scmp.ne.s32.totalorder %s2917_s14, %s2579_s10  ;;  %p2588_p9 = scmp.lt.s32.totalorder %s2579_s10, %s2579_s10 }
  0x38   : > { %p2582_p2 = pnand %p2580_p0, %p2929_p8  ;;  %p2589_p4 = por %p2588_p9, %p2587_p7 }
  0x3a   : > { %p2583_p5 = pneg %p2582_p2 }
  0x3c   : > { %p2590_p10 = pnand %p2589_p4, %p2583_p5 }
  0x3e   : > { %2593 = shalt.err (!%p2590_p10)
}
  0x3f   : > { %s2821_s16 = smov 256   ;;  %s2822_s18 = smov 16  }
  0x40   : > { %2232 = dma.hbm_to_vmem [thread:$0]  (!%p2913_p6), %s3272_s3, 8192, %s2917_s14, [#allocation9], %s2821_s16, %s2821_s16, %s2822_s18  }
  0x41   : > { %s2594_s24 = scalar_lea.hbm %s3274_s5, 4096 }
  0x42   : > { %p2595_p11 = scmp.ne.s32.totalorder %s3274_s5, %s2594_s24  ;;  %p2601_p0 = scmp.lt.u32.totalorder %s2594_s24, %s3274_s5 }
  0x44   : > { %p2597_p12 = pnand %p2595_p11, %p2929_p8 }
  0x46   : > { %p2598_p13 = pneg %p2597_p12 }
  0x48   : > { %p2603_p2 = pnand %p2601_p0, %p2598_p13 }
  0x4a   : > { %2606 = shalt.err (!%p2603_p2)
}
  0x4b   : > { %s2607_s19 = scalar_lea.vmem %s292_s17, 4096  ;;  %p2615_p4 = scmp.lt.s32.totalorder %s292_s17, %s292_s17 }
  0x4c   : > { %p2608_p5 = scmp.ne.s32.totalorder %s292_s17, %s2607_s19  ;;  %p2616_p10 = scmp.lt.s32.totalorder %s2607_s19, %s2607_s19 }
  0x4e   : > { %p2610_p7 = pnand %p2608_p5, %p2929_p8  ;;  %p2617_p1 = por %p2616_p10, %p2615_p4 }
  0x50   : > { %p2611_p9 = pneg %p2610_p7 }
  0x52   : > { %p2618_p3 = pnand %p2617_p1, %p2611_p9 }
  0x54   : > { %2621 = shalt.err (!%p2618_p3)
}
  0x55   : > { %s3288_s14 = smov 128   ;;  %s2823_s18 = smov [#allocation7]  }
  0x56   : > { %2238 = dma.hbm_to_vmem [thread:$0]  (!%p2913_p6), %s3274_s5, 4096, %s292_s17, [#allocation12], %s3288_s14, %s3288_s14, %s2820_s13  }
  0x57   : > { %s257_s20 = sshll.u32 %s2823_s18, 4  ;;  %s2824_s21 = smov [#allocation10]   ;;  %s258_s20 = int_to_ptr.vmem [resolvable:$true] %s257_s20 }
  0x58   : > { %s281_s22 = sshll.u32 %s2824_s21, 4  ;;  %s2622_s26 = scalar_lea.hbm %s3271_s2, 128  ;;  %s282_s22 = int_to_ptr.vmem [resolvable:$true] %s281_s22 }
  0x59   : > { %p2623_p1 = scmp.ne.s32.totalorder %s3271_s2, %s2622_s26  ;;  %p2629_p12 = scmp.lt.u32.totalorder %s2622_s26, %s3271_s2 }
  0x5b   : > { %p2625_p3 = pnand %p2623_p1, %p2929_p8 }
  0x5d   : > { %p2626_p11 = pneg %p2625_p3 }
  0x5f   : > { %p2631_p13 = pnand %p2629_p12, %p2626_p11 }
  0x61   : > { %2634 = shalt.err (!%p2631_p13)
}
  0x62   : > { %s2635_s17 = scalar_lea.vmem %s258_s20, 128  ;;  %p2643_p7 = scmp.lt.s32.totalorder %s258_s20, %s258_s20 }
  0x63   : > { %p2636_p0 = scmp.ne.s32.totalorder %s258_s20, %s2635_s17  ;;  %p2644_p9 = scmp.lt.s32.totalorder %s2635_s17, %s2635_s17 }
  0x65   : > { %p2638_p2 = pnand %p2636_p0, %p2929_p8  ;;  %p2645_p4 = por %p2644_p9, %p2643_p7 }
  0x67   : > { %p2639_p5 = pneg %p2638_p2 }
  0x69   : > { %p2646_p10 = pnand %p2645_p4, %p2639_p5 }
  0x6b   : > { %2649 = shalt.err (!%p2646_p10)
}
  0x6c   : > { %2229 = dma.hbm_to_vmem [thread:$0]  (!%p2913_p6), %s3271_s2, 128, %s258_s20, [#allocation6]  }
  0x6d   : > { %s2650_s24 = scalar_lea.hbm %s3273_s4, 512 }
  0x6e   : > { %p2651_p1 = scmp.ne.s32.totalorder %s3273_s4, %s2650_s24  ;;  %p2657_p12 = scmp.lt.u32.totalorder %s2650_s24, %s3273_s4 }
  0x70   : > { %p2653_p3 = pnand %p2651_p1, %p2929_p8 }
  0x72   : > { %p2654_p11 = pneg %p2653_p3 }
  0x74   : > { %p2659_p13 = pnand %p2657_p12, %p2654_p11 }
  0x76   : > { %2662 = shalt.err (!%p2659_p13)
}
  0x77   : > { %s2663_s9 = scalar_lea.vmem %s282_s22, 512  ;;  %p2671_p7 = scmp.lt.s32.totalorder %s282_s22, %s282_s22 }
  0x78   : > { %p2664_p0 = scmp.ne.s32.totalorder %s282_s22, %s2663_s9  ;;  %p2672_p9 = scmp.lt.s32.totalorder %s2663_s9, %s2663_s9 }
  0x7a   : > { %p2666_p2 = pnand %p2664_p0, %p2929_p8  ;;  %p2673_p4 = por %p2672_p9, %p2671_p7 }
  0x7c   : > { %p2667_p5 = pneg %p2666_p2 }
  0x7e   : > { %p2674_p10 = pnand %p2673_p4, %p2667_p5 }
  0x80   : > { %2677 = shalt.err (!%p2674_p10)
}
  0x81   : > { %2235 = dma.hbm_to_vmem [thread:$0]  (!%p2913_p6), %s3273_s4, 512, %s282_s22, [#allocation9]  }
  0x82   : > { %s2825_s16 = smov [#allocation13]   ;;  %s2678_s24 = scalar_lea.hbm %s3275_s6, 4096 }
  0x83   : > { %s304_s18 = sshll.u32 %s2825_s16, 4  ;;  %p2679_p1 = scmp.ne.s32.totalorder %s3275_s6, %s2678_s24  ;;  %s305_s18 = int_to_ptr.vmem [resolvable:$true] %s304_s18 }
  0x84   : > { %p2685_p12 = scmp.lt.u32.totalorder %s2678_s24, %s3275_s6 }
  0x85   : > { %p2681_p3 = pnand %p2679_p1, %p2929_p8 }
  0x87   : > { %p2682_p11 = pneg %p2681_p3 }
  0x89   : > { %p2687_p13 = pnand %p2685_p12, %p2682_p11 }
  0x8b   : > { %2690 = shalt.err (!%p2687_p13)
}
  0x8c   : > { %s2691_s22 = scalar_lea.vmem %s305_s18, 4096  ;;  %p2699_p7 = scmp.lt.s32.totalorder %s305_s18, %s305_s18 }
  0x8d   : > { %p2692_p0 = scmp.ne.s32.totalorder %s305_s18, %s2691_s22  ;;  %p2700_p9 = scmp.lt.s32.totalorder %s2691_s22, %s2691_s22 }
  0x8f   : > { %p2694_p2 = pnand %p2692_p0, %p2929_p8  ;;  %p2701_p4 = por %p2700_p9, %p2699_p7 }
  0x91   : > { %p2695_p5 = pneg %p2694_p2 }
  0x93   : > { %p2702_p10 = pnand %p2701_p4, %p2695_p5 }
  0x95   : > { %2705 = shalt.err (!%p2702_p10)
}
  0x96   : > { %2241 = dma.hbm_to_vmem [thread:$0]  (!%p2913_p6), %s3275_s6, 4096, %s305_s18, [#allocation12], %s3288_s14, %s3288_s14, %s2820_s13  }
  0x97   : > { %s1986_s15 = sadd.s32 4294967294, %s2814_s30   ;;  %s3057_s23 = sadd.s32 1, %s2814_s30  }
  0x98   : > { %s31_s17 = ssub.s32 %s2814_s30, %s3057_s23  ;;  %s34_s16 = sadd.s32 1, %s2810_s29 }
  0x99   : > { %p32_p8 = scmp.eq.s32.totalorder %s31_s17, 0  ;;  %p41_p1 = scmp.ne.s32.totalorder %s2810_s29, %s2806_s28 }
  0x9a   : > { %p42_p3 = scmp.eq.s32.totalorder %s2814_s30, 0  ;;  %p47_p11 = scmp.ne.s32.totalorder %s2806_s28, %s2802_s27 }
  0x9b   : > { %s3068_s1 = scalar_select %p32_p8, %s2810_s29, %s34_s16  }
  0x9c   : > { %p3070_p12 = por %p42_p3, %p41_p1  ;;  %p3290_p13 = scmp.eq.s32.totalorder %s2897_s11, 0 }
  0x9d   : > { %p218_p0 = scmp.eq.s32.totalorder %s2897_s11, 1  ;;  %p224_p2 = scmp.eq.s32.totalorder %s1986_s15, 1 }
  0x9e   : > { %p3076_p6 = por %p3290_p13, %p47_p11  ;;  %p2256_p5 = scmp.lt.s32.totalorder %s2814_s30, 2 }
  0x9f   : > { %s321_s14 = sand.u32 1, %s2810_s29   ;;  %p3083_p7 = por %p218_p0, %p41_p1 }
  0xa0   : > { %p3087_p9 = por %p224_p2, %p47_p11  ;;  %s1995_s25 = sshll.u32 %s321_s14, 2 }
  0xa1   : > { %s3292_s18 = scalar_select %p3083_p7, 1, 0 }
  0xa2   : > { %s3293_s24 = scalar_select %p3087_p9, 1, 0 }
  0xa3   : > { %s1996_s26 = sshll.u32 %s2814_s30, 6  ;;  %s325_s9 = scalar_lea.vmem [#allocation2], %s1995_s25 }
  0xa4   : > { %s3095_s22 = scalar_lea.hbm %s3269_s0, %s1996_s26  ;;  %s332_s20 = sshll.u32 %s325_s9, 4  ;;  %s3097_s20 = int_to_ptr.vmem [resolvable:$true] %s332_s20 }
  0xa5   : > { %p3101_p4 = pnand %p2256_p5, %p3070_p12  ;;  %s322_s17 = scalar_lea.sflag [#allocation3], %s321_s14 }
  0xa6   : > { %s2706_s16 = scalar_lea.hbm %s3095_s22, 64  ;;  %s2711_s10 = scalar_lea.hbm %s3269_s0, 128 }
  0xa7   : > { %p2707_p10 = scmp.ne.s32.totalorder %s3095_s22, %s2706_s16  ;;  %p2708_p8 = pneg %p3101_p4 }
  0xa8   : > { %p2712_p11 = scmp.lt.u32.totalorder %s3095_s22, %s3269_s0  ;;  %p2713_p12 = scmp.lt.u32.totalorder %s2711_s10, %s2706_s16 }
  0xa9   : > { %p2709_p1 = pnand %p2708_p8, %p2707_p10  ;;  %p2715_p0 = scmp.lt.u32.totalorder %s2706_s16, %s3095_s22 }
  0xaa   : > { %p2714_p13 = por %p2713_p12, %p2712_p11 }
  0xab   : > { %p2710_p3 = pneg %p2709_p1 }
  0xac   : > { %p2716_p2 = por %p2715_p0, %p2714_p13 }
  0xae   : > { %p2717_p5 = pnand %p2716_p2, %p2710_p3 }
  0xb0   : > { %2720 = shalt.err (!%p2717_p5)
}
  0xb1   : > { %s2721_s14 = scalar_lea.vmem %s3097_s20, 64  ;;  %s2826_s9 = smov [#allocation2]  }
  0xb2   : > { %p2722_p10 = scmp.ne.s32.totalorder %s3097_s20, %s2721_s14  ;;  %s2726_s25 = sshll.u32 %s2826_s9, 4  ;;  %s2727_s25 = int_to_ptr.vmem [resolvable:$false] %s2726_s25 }
  0xb3   : > { %s2728_s26 = scalar_lea.vmem %s2727_s25, 128  ;;  %p2729_p7 = scmp.lt.s32.totalorder %s3097_s20, %s2727_s25 }
  0xb4   : > { %p2724_p1 = pnand %p2722_p10, %p2708_p8  ;;  %p2730_p11 = scmp.lt.s32.totalorder %s2728_s26, %s2721_s14 }
  0xb6   : > { %p2725_p9 = pneg %p2724_p1  ;;  %p2731_p12 = por %p2730_p11, %p2729_p7 }
  0xb8   : > { %p2732_p13 = pnand %p2731_p12, %p2725_p9 }
  0xba   : > { %2735 = shalt.err (!%p2732_p13)
}
  0xbb   : > { %2245 = dma.hbm_to_vmem [thread:$0]  (!%p3101_p4), %s3095_s22, 64, %s3097_s20, %s322_s17  }
  0xbc   : > { %p3295_p3 = scmp.ne.s32.totalorder %s3284_s12, 0 }
  0xbd   : > { %s3133_s16 = sand.u32 (!%p3295_p3), 1, %s2806_s28  }
  0xbe   : > { %341 = sbr.rel (%p3295_p3) target bundleno = 3039 (0xbdf), region = 52  ;;  %s1998_s10 = sshll.u32 (!%p3295_p3), %s3133_s16, 2 }
  0xbf   : > { %s344_s21 = scalar_lea.sflag (!%p3295_p3), [#allocation3], %s3133_s16  ;;  %s3137_s19 = scalar_lea.vmem (!%p3295_p3), [#allocation2], %s1998_s10 }
  0xc5   : > { %2781 = dma.done.wait (%p3076_p6), %s344_s21, 64  }
  0xc6   : > { %2783 = vsyncadd (%p3076_p6), %s344_s21, 4294967232  ;;  %p3296_p7 = scmp.eq.s32.totalorder %s2897_s11, 0 }
  0xc8   : > { %2785 = dma.done.wait (%p3296_p7), [#allocation6], 2176   ;;  %p3297_p9 = pmov %p3296_p7 }
  0xc9   : > { %p3298_p4 = pmov %p3296_p7 }
  0xca   : > { %2787 = vsyncadd (%p3297_p9), [#allocation6], 4294965120 }
  0xcb   : > { %2789 = dma.done.wait (%p3298_p4), [#allocation9], 8704   ;;  %p3299_p8 = pmov %p3298_p4 }
  0xcc   : > { %p3300_p0 = pmov %p3298_p4 }
  0xcd   : > { %2791 = vsyncadd (%p3299_p8), [#allocation9], 4294958592 }
  0xce   : > { %2793 = dma.done.wait (%p3300_p0), [#allocation12], 8192   ;;  %p3301_p2 = pmov %p3300_p0 }
  0xcf   : > { %v2827_v0 = vmov 0   ;;  %v2309_v1 = vld [vmem:[#allocation5 + $0x4] ss:$8 sps:$4 sm:$0xff]   ;;  %v2311_v2 = vld [vmem:[#allocation5] ss:$8 sps:$4 sm:$0xff]   ;;  %vm2829_vm0 = vmmov 0  }
  0xd0   : > { %2795 = vsyncadd (%p3301_p2), [#allocation12], 4294959104  ;;  %534 = vmatprep.mubr.bf16.mxu1 %v2827_v0  ;;  %502 = vmatprep.subr.bf16.mxu1 %v2309_v1  ;;  %v2312_v3 = vld [vmem:[#allocation5 + $0x14] ss:$8 sps:$4 sm:$0xff]   ;;  %v2314_v4 = vld [vmem:[#allocation5 + $0x10] ss:$8 sps:$4 sm:$0xff]  }
  0xd1   : > { %503 = vmatpush1.bf16.msra.mxu1 %v2311_v2  ;;  %v2315_v5 = vld [vmem:[#allocation5 + $0x24] ss:$8 sps:$4 sm:$0xff]   ;;  %v2317_v6 = vld [vmem:[#allocation5 + $0x20] ss:$8 sps:$4 sm:$0xff]   ;;  %v2318_v7 = vld [vmem:[#allocation5 + $0x34] ss:$8 sps:$4 sm:$0xff]  }
  0xd2   : > { %504 = vmatprep.subr.bf16.mxu1 %v2312_v3  ;;  %v2320_v8 = vld [vmem:[#allocation5 + $0x30] ss:$8 sps:$4 sm:$0xff]   ;;  %v2321_v9 = vld [vmem:[#allocation5 + $0x44] ss:$8 sps:$4 sm:$0xff]   ;;  %v2323_v10 = vld [vmem:[#allocation5 + $0x40] ss:$8 sps:$4 sm:$0xff]  }
  0xd3   : > { %v2324_v11 = vld [vmem:[#allocation5 + $0x54] ss:$8 sps:$4 sm:$0xff]   ;;  %v2326_v12 = vld [vmem:[#allocation5 + $0x50] ss:$8 sps:$4 sm:$0xff]   ;;  %v2327_v13 = vld [vmem:[#allocation5 + $0x64] ss:$8 sps:$4 sm:$0xff]  }
  0xd4   : > { %v2329_v14 = vld [vmem:[#allocation5 + $0x60] ss:$8 sps:$4 sm:$0xff]   ;;  %v2330_v15 = vld [vmem:[#allocation5 + $0x74] ss:$8 sps:$4 sm:$0xff]   ;;  %v2332_v16 = vld [vmem:[#allocation5 + $0x70] ss:$8 sps:$4 sm:$0xff]  }
  0xd5   : > { %505 = vmatpush1.bf16.msra.mxu1 %v2314_v4  ;;  %v405_v17 = vld [vmem:[%s3137_s19] sm:$0xf]  ;;  %v2336_v25 = vld [vmem:[#allocation8 + $0xc] ss:$16 sps:$4 sm:$0xff]   ;;  %v2338_v26 = vld [vmem:[#allocation8 + $0x8] ss:$16 sps:$4 sm:$0xff]  }
  0xd6   : > { %506 = vmatprep.subr.bf16.mxu1 %v2315_v5  ;;  %v2333_v23 = vld [vmem:[#allocation8] ss:$16 sps:$4 sm:$0xff]   ;;  %v2335_v24 = vld [vmem:[#allocation8 + $0x4] ss:$16 sps:$4 sm:$0xff]   ;;  %1020 = vmatprep.subr.bf16.mxu0 %v2336_v25  ;;  %v2342_v28 = vld [vmem:[#allocation8 + $0x2c] ss:$16 sps:$4 sm:$0xff]  }
  0xd7   : > { %v2341_v27 = vld [vmem:[#allocation8 + $0x24] ss:$16 sps:$4 sm:$0xff]   ;;  %1021 = vmatpush1.bf16.msra.mxu0 %v2338_v26  ;;  %v2339_v29 = vld [vmem:[#allocation8 + $0x20] ss:$16 sps:$4 sm:$0xff]   ;;  %v2344_v30 = vld [vmem:[#allocation8 + $0x28] ss:$16 sps:$4 sm:$0xff]  }
  0xd8   : > { %1022 = vmatprep.subr.bf16.mxu0 %v2342_v28  ;;  %v2347_v31 = vld [vmem:[#allocation8 + $0x44] ss:$16 sps:$4 sm:$0xff]   ;;  %v2348_v32 = vld [vmem:[#allocation8 + $0x4c] ss:$16 sps:$4 sm:$0xff]   ;;  %v2345_v33 = vld [vmem:[#allocation8 + $0x40] ss:$16 sps:$4 sm:$0xff]  }
  0xd9   : > { %507 = vmatpush1.bf16.msra.mxu1 %v2317_v6  ;;  %v2350_v34 = vld [vmem:[#allocation8 + $0x48] ss:$16 sps:$4 sm:$0xff]   ;;  %v2353_v35 = vld [vmem:[#allocation8 + $0x64] ss:$16 sps:$4 sm:$0xff]   ;;  %v2354_v36 = vld [vmem:[#allocation8 + $0x6c] ss:$16 sps:$4 sm:$0xff]  }
  0xda   : > { %508 = vmatprep.subr.bf16.mxu1 %v2318_v7  ;;  %v2351_v37 = vld [vmem:[#allocation8 + $0x60] ss:$16 sps:$4 sm:$0xff]   ;;  %v2356_v38 = vld [vmem:[#allocation8 + $0x68] ss:$16 sps:$4 sm:$0xff]   ;;  %v2359_v39 = vld [vmem:[#allocation8 + $0x84] ss:$16 sps:$4 sm:$0xff]  }
  0xdb   : > { %1023 = vmatpush1.bf16.msra.mxu0 %v2344_v30  ;;  %v2360_v40 = vld [vmem:[#allocation8 + $0x8c] ss:$16 sps:$4 sm:$0xff]   ;;  %v2357_v41 = vld [vmem:[#allocation8 + $0x80] ss:$16 sps:$4 sm:$0xff]   ;;  %v2362_v42 = vld [vmem:[#allocation8 + $0x88] ss:$16 sps:$4 sm:$0xff]  }
  0xdc   : > { %1024 = vmatprep.subr.bf16.mxu0 %v2348_v32  ;;  %v2365_v43 = vld [vmem:[#allocation8 + $0xa4] ss:$16 sps:$4 sm:$0xff]   ;;  %v2366_v44 = vld [vmem:[#allocation8 + $0xac] ss:$16 sps:$4 sm:$0xff]   ;;  %v2363_v45 = vld [vmem:[#allocation8 + $0xa0] ss:$16 sps:$4 sm:$0xff]  }
  0xdd   : > { %509 = vmatpush1.bf16.msra.mxu1 %v2320_v8  ;;  %v2368_v46 = vld [vmem:[#allocation8 + $0xa8] ss:$16 sps:$4 sm:$0xff]   ;;  %v2371_v47 = vld [vmem:[#allocation8 + $0xc4] ss:$16 sps:$4 sm:$0xff]   ;;  %v2372_v48 = vld [vmem:[#allocation8 + $0xcc] ss:$16 sps:$4 sm:$0xff]  }
  0xde   : > { %510 = vmatprep.subr.bf16.mxu1 %v2321_v9  ;;  %v2369_v49 = vld [vmem:[#allocation8 + $0xc0] ss:$16 sps:$4 sm:$0xff]   ;;  %v2374_v50 = vld [vmem:[#allocation8 + $0xc8] ss:$16 sps:$4 sm:$0xff]   ;;  %v2377_v51 = vld [vmem:[#allocation8 + $0xe4] ss:$16 sps:$4 sm:$0xff]  }
  0xdf   : > { %1025 = vmatpush1.bf16.msra.mxu0 %v2350_v34  ;;  %v2378_v52 = vld [vmem:[#allocation8 + $0xec] ss:$16 sps:$4 sm:$0xff]   ;;  %v2375_v53 = vld [vmem:[#allocation8 + $0xe0] ss:$16 sps:$4 sm:$0xff]   ;;  %v2380_v54 = vld [vmem:[#allocation8 + $0xe8] ss:$16 sps:$4 sm:$0xff]  }
  0xe0   : > { %1026 = vmatprep.subr.bf16.mxu0 %v2354_v36  ;;  %v2383_v55 = vld [vmem:[#allocation8 + $0x104] ss:$16 sps:$4 sm:$0xff]   ;;  %v2384_v56 = vld [vmem:[#allocation8 + $0x10c] ss:$16 sps:$4 sm:$0xff]   ;;  %v2381_v57 = vld [vmem:[#allocation8 + $0x100] ss:$16 sps:$4 sm:$0xff]  }
  0xe1   : > { %511 = vmatpush1.bf16.msra.mxu1 %v2323_v10  ;;  %v2386_v58 = vld [vmem:[#allocation8 + $0x108] ss:$16 sps:$4 sm:$0xff]   ;;  %v2389_v59 = vld [vmem:[#allocation8 + $0x124] ss:$16 sps:$4 sm:$0xff]   ;;  %v2390_v60 = vld [vmem:[#allocation8 + $0x12c] ss:$16 sps:$4 sm:$0xff]  }
  0xe2   : > { %512 = vmatprep.subr.bf16.mxu1 %v2324_v11  ;;  %v2387_v61 = vld [vmem:[#allocation8 + $0x120] ss:$16 sps:$4 sm:$0xff]   ;;  %v2392_v62 = vld [vmem:[#allocation8 + $0x128] ss:$16 sps:$4 sm:$0xff]   ;;  %v2395_v7 = vld [vmem:[#allocation8 + $0x144] ss:$16 sps:$4 sm:$0xff]  }
  0xe3   : > { %1027 = vmatpush1.bf16.msra.mxu0 %v2356_v38  ;;  %v2396_v8 = vld [vmem:[#allocation8 + $0x14c] ss:$16 sps:$4 sm:$0xff]   ;;  %v2393_v9 = vld [vmem:[#allocation8 + $0x140] ss:$16 sps:$4 sm:$0xff]   ;;  %v2398_v10 = vld [vmem:[#allocation8 + $0x148] ss:$16 sps:$4 sm:$0xff]  }
  0xe4   : > { %1028 = vmatprep.subr.bf16.mxu0 %v2360_v40  ;;  %v2401_v11 = vld [vmem:[#allocation8 + $0x164] ss:$16 sps:$4 sm:$0xff]   ;;  %v2417_v25 = vld [vmem:[#allocation8 + $0x1c0] ss:$16 sps:$4 sm:$0xff]   ;;  %v2422_v26 = vld [vmem:[#allocation8 + $0x1c8] ss:$16 sps:$4 sm:$0xff]  }
  0xe5   : > { %513 = vmatpush1.bf16.msra.mxu1 %v2326_v12  ;;  %v2402_v12 = vld [vmem:[#allocation8 + $0x16c] ss:$16 sps:$4 sm:$0xff]   ;;  %v2428_v30 = vld [vmem:[#allocation8 + $0x1e8] ss:$16 sps:$4 sm:$0xff]   ;;  %vm1123_vm1 = vcmask 1043456   ;;  %vm1107_vm2 = vcmask 64512  }
  0xe6   : > { %514 = vmatprep.subr.bf16.mxu1 %v2327_v13  ;;  %v2399_v13 = vld [vmem:[#allocation8 + $0x160] ss:$16 sps:$4 sm:$0xff]   ;;  %v2426_v28 = vld [vmem:[#allocation8 + $0x1ec] ss:$16 sps:$4 sm:$0xff]   ;;  %s2005_s10 = sshll.u32 %s3133_s16, 4  ;;  %s2162_s12 = sshll.u32 %s2897_s11, 8 }
  0xe7   : > { %1029 = vmatpush1.bf16.msra.mxu0 %v2362_v42  ;;  %v543_v38 = vld [vmem:[%s3276_s7] ss:$8 sm:$0x3]  ;;  %s403_s21 = scalar_lea.vmem [#allocation14], %s2005_s10  ;;  %s3227_s20 = scalar_lea.hbm %s3277_s8, %s2162_s12 }
  0xe8   : > { %1030 = vmatprep.subr.bf16.mxu0 %v2366_v44  ;;  %s1859_s19 = sshll.u32 %s403_s21, 4  ;;  %s1845_s15 = scalar_lea.sflag [#allocation4], %s3133_s16  ;;  %s3222_s19 = int_to_ptr.vmem [resolvable:$true] %s1859_s19 }
  0xe9   : > { %515 = vmatpush1.bf16.msra.mxu1 %v2329_v14  ;;  %v2404_v14 = vld [vmem:[#allocation8 + $0x168] ss:$16 sps:$4 sm:$0xff]   ;;  %s2736_s17 = scalar_lea.vmem %s3222_s19, 256  ;;  %p3302_p5 = scmp.ne.s32.totalorder %s3292_s18, 0 }
  0xea   : > { %516 = vmatprep.subr.bf16.mxu1 %v2330_v15  ;;  %v2407_v15 = vld [vmem:[#allocation8 + $0x184] ss:$16 sps:$4 sm:$0xff]   ;;  %p2737_p6 = scmp.ne.s32.totalorder %s3222_s19, %s2736_s17  ;;  %s2830_s11 = smov [#allocation14]  }
  0xeb   : > { %1031 = vmatpush1.bf16.msra.mxu0 %v2368_v46  ;;  %s2740_s14 = sshll.u32 %s2830_s11, 4  ;;  %s2741_s14 = int_to_ptr.vmem [resolvable:$false] %s2740_s14 }
  0xec   : > { %1032 = vmatprep.subr.bf16.mxu0 %v2372_v48  ;;  %p2738_p10 = pnand %p2737_p6, %p3302_p5  ;;  %s2742_s9 = scalar_lea.vmem %s2741_s14, 512 }
  0xed   : > { %517 = vmatpush1.bf16.msra.mxu1 %v2332_v16  ;;  %v2408_v16 = vld [vmem:[#allocation8 + $0x18c] ss:$16 sps:$4 sm:$0xff]   ;;  %p2743_p11 = scmp.lt.s32.totalorder %s3222_s19, %s2741_s14  ;;  %p2744_p12 = scmp.lt.s32.totalorder %s2742_s9, %s2736_s17 }
  0xee   : > { %979 = vmatprep.subr.bf16.mxu1 %v2335_v24  ;;  %v2420_v24 = vld [vmem:[#allocation8 + $0x1cc] ss:$16 sps:$4 sm:$0xff]   ;;  %p2739_p1 = pneg %p2738_p10 }
  0xef   : > { %1033 = vmatpush1.bf16.msra.mxu0 %v2374_v50  ;;  %p2745_p13 = por %p2744_p12, %p2743_p11 }
  0xf0   : > { %535 = vmatmul.mubr.bf16.vlgmr.msra.gmra.mrb[0].mxu1 %v405_v17  ;;  %1034 = vmatprep.subr.bf16.mxu0 %v2378_v52  ;;  %v2405_v17 = vld [vmem:[#allocation8 + $0x180] ss:$16 sps:$4 sm:$0xff]  }
  0xf1   : > { %980 = vmatpush1.bf16.msra.mxu1 %v2333_v23  ;;  %v2419_v23 = vld [vmem:[#allocation8 + $0x1c4] ss:$16 sps:$4 sm:$0xff]   ;;  %p2746_p3 = pnand %p2745_p13, %p2739_p1 }
  0xf2   : > { %981 = vmatprep.subr.bf16.mxu1 %v2341_v27  ;;  %v2425_v27 = vld [vmem:[#allocation8 + $0x1e4] ss:$16 sps:$4 sm:$0xff]  }
  0xf3   : > { %1035 = vmatpush1.bf16.msra.mxu0 %v2380_v54  ;;  %v655_v54 = vld [vmem:[#allocation10] sm:$0xff] }
  0xf4   : > { %1036 = vmatprep.subr.bf16.mxu0 %v2384_v56 }
  0xf5   : > { %982 = vmatpush1.bf16.msra.mxu1 %v2339_v29  ;;  %v2423_v29 = vld [vmem:[#allocation8 + $0x1e0] ss:$16 sps:$4 sm:$0xff]  }
  0xf6   : > { %983 = vmatprep.subr.bf16.mxu1 %v2347_v31 }
  0xf7   : > { %1037 = vmatpush1.bf16.msra.mxu0 %v2386_v58 }
  0xf8   : > { %1038 = vmatprep.subr.bf16.mxu0 %v2390_v60 }
  0xf9   : > { %984 = vmatpush1.bf16.msra.mxu1 %v2345_v33  ;;  %v564_v33 = vlaneseq }
  0xfa   : > { %985 = vmatprep.subr.bf16.mxu1 %v2353_v35 }
  0xfb   : > { %1039 = vmatpush1.bf16.msra.mxu0 %v2392_v62  ;;  %v565_v35 = vshrl.u32 %v564_v33, 7 }
  0xfc   : > { %1040 = vmatprep.subr.bf16.mxu0 %v2396_v8 }
  0xfd   : > { %986 = vmatpush1.bf16.msra.mxu1 %v2351_v37  ;;  %v3173_v36 = vsub.s32 0, %v565_v35  ;;  %v3175_v37 = vsub.s32 1, %v565_v35 }
  0xfe   : > { %987 = vmatprep.subr.bf16.mxu1 %v2359_v39  ;;  %v2022_v39 = vld [vmem:[%s3276_s7 + $0x1] ss:$8 sm:$0x3] }
  0xff   : > { %1041 = vmatpush1.bf16.msra.mxu0 %v2398_v10  ;;  %v567_v40 = vrot.slane %v543_v38, %v3173_v36  ;;  %v580_v44 = vrot.slane %v2022_v39, %v3173_v36 }
 0x100   : > { %1042 = vmatprep.subr.bf16.mxu0 %v2402_v12 }
 0x101   : > { %988 = vmatpush1.bf16.msra.mxu1 %v2357_v41  ;;  %v571_v41 = vrot.slane %v543_v38, %v3175_v37 }
 0x102   : > { %989 = vmatprep.subr.bf16.mxu1 %v2365_v43 }
 0x103   : > { %1043 = vmatpush1.bf16.msra.mxu0 %v2404_v14 }
 0x104   : > { %1044 = vmatprep.subr.bf16.mxu0 %v2408_v16 }
 0x105   : > { %990 = vmatpush1.bf16.msra.mxu1 %v2363_v45  ;;  %v584_v45 = vrot.slane %v2022_v39, %v3175_v37 }
 0x106   : > { %991 = vmatprep.subr.bf16.mxu1 %v2371_v47 }
 0x109   : > { %992 = vmatpush1.bf16.msra.mxu1 %v2369_v49 }
 0x10a   : > { %993 = vmatprep.subr.bf16.mxu1 %v2377_v51 }
 0x10d   : > { %994 = vmatpush1.bf16.msra.mxu1 %v2375_v53  ;;  %v2828_v53 = vmov 0.0  }
 0x10e   : > { %995 = vmatprep.subr.bf16.mxu1 %v2383_v55  ;;  %v658_v55 = vld [vmem:[#allocation10 + $0x18] sm:$0xff] }
 0x111   : > { %996 = vmatpush1.bf16.msra.mxu1 %v2381_v57 }
 0x112   : > { %997 = vmatprep.subr.bf16.mxu1 %v2389_v59  ;;  %v657_v59 = vld [vmem:[#allocation10 + $0x10] sm:$0xff] }
 0x115   : > { %998 = vmatpush1.bf16.msra.mxu1 %v2387_v61 }
 0x116   : > { %999 = vmatprep.subr.bf16.mxu1 %v2395_v7 }
 0x119   : > { %1000 = vmatpush1.bf16.msra.mxu1 %v2393_v9  ;;  %v1065_v9 = vld [vmem:[#allocation7] sm:$0xff] }
 0x11a   : > { %1001 = vmatprep.subr.bf16.mxu1 %v2401_v11 }
 0x11d   : > { %1002 = vmatpush1.bf16.msra.mxu1 %v2399_v13 }
 0x11e   : > { %1003 = vmatprep.subr.bf16.mxu1 %v2407_v15 }
 0x121   : > { %1004 = vmatpush1.bf16.msra.mxu1 %v2405_v17 }
 0x1c3   : > { %v3157_v18 = vpop.f32.mrb[0].mxu1 }
 0x1c4   : > { %v3159_v19 = vpop.f32.mrb[1].mxu1 }
 0x1c5   : > { %v540_v20 = vpop.f32.mrb[2].mxu1  ;;  %v546_v21 = vadd.f32 %v3159_v19, %v3157_v18 }
 0x1c6   : > { %v541_v22 = vpop.f32.mrb[3].mxu1  ;;  %v2414_v20 = vld [vmem:[#allocation8 + $0x1ac] ss:$16 sps:$4 sm:$0xff]  }
 0x1c7   : > { %547 = vadd.xlane.f32.xlu0 %v546_v21  ;;  %v2411_v21 = vld [vmem:[#allocation8 + $0x1a0] ss:$16 sps:$4 sm:$0xff]   ;;  %v2416_v22 = vld [vmem:[#allocation8 + $0x1a8] ss:$16 sps:$4 sm:$0xff]  }
 0x254   : > { %v548_v63 = vpop.xlane.xlu0 %547 }
 0x255   : > { %v550_v1 = vmul.f32 0.00390625, %v548_v63 }
 0x257   : > { %v3164_v2 = vsub.f32 %v3157_v18, %v550_v1  ;;  %v3167_v3 = vsub.f32 %v3159_v19, %v550_v1  ;;  %v2410_v18 = vld [vmem:[#allocation8 + $0x188] ss:$16 sps:$4 sm:$0xff]   ;;  %v2413_v19 = vld [vmem:[#allocation8 + $0x1a4] ss:$16 sps:$4 sm:$0xff]  }
 0x258   : > { %1045 = vmatpush1.bf16.msra.mxu0 %v2410_v18  ;;  %1005 = vmatprep.subr.bf16.mxu1 %v2413_v19 }
 0x259   : > { %v553_v4 = vmul.f32 %v3164_v2, %v3164_v2  ;;  %v554_v5 = vmul.f32 %v3167_v3, %v3167_v3  ;;  %1046 = vmatprep.subr.bf16.mxu0 %v2414_v20  ;;  %1006 = vmatpush1.bf16.msra.mxu1 %v2411_v21 }
 0x25a   : > { %1007 = vmatprep.subr.bf16.mxu1 %v2419_v23  ;;  %v656_v23 = vld [vmem:[#allocation10 + $0x8] sm:$0xff] }
 0x25b   : > { %v555_v6 = vadd.f32 %v554_v5, %v553_v4 }
 0x25c   : > { %1047 = vmatpush1.bf16.msra.mxu0 %v2416_v22 }
 0x25d   : > { %556 = vadd.xlane.f32.xlu0 %v555_v6  ;;  %1048 = vmatprep.subr.bf16.mxu0 %v2420_v24 }
 0x25e   : > { %1008 = vmatpush1.bf16.msra.mxu1 %v2417_v25 }
 0x25f   : > { %1009 = vmatprep.subr.bf16.mxu1 %v2425_v27 }
 0x260   : > { %1049 = vmatpush1.bf16.msra.mxu0 %v2422_v26 }
 0x261   : > { %1050 = vmatprep.subr.bf16.mxu0 %v2426_v28 }
 0x262   : > { %1010 = vmatpush1.bf16.msra.mxu1 %v2423_v29  ;;  %v2088_v29 = vcombine.high %v1065_v9, %v1065_v9 }
 0x263   : > { %2171 = vmatprep.subr.bf16.mxu1 %v2828_v53 }
 0x264   : > { %1051 = vmatpush1.bf16.msra.mxu0 %v2428_v30 }
 0x2ea   : > { %v557_v31 = vpop.xlane.xlu0 %556 }
 0x2eb   : > { %v558_v32 = vmul.f32 0.00390625, %v557_v31 }
 0x2ed   : > { %v559_v34 = vadd.f32 1e-06, %v558_v32 }
 0x2ef   : > { %2526 = vrsqrt.f32 %v559_v34 }
 0x2f9   : > { %v2527_v42 = vpop.eup %2526 }
 0x2fa   : > { %v562_v43 = vmul.f32 %v2527_v42, %v3167_v3  ;;  %v561_v46 = vmul.f32 %v2527_v42, %v3164_v2 }
 0x2fc   : > { %v575_v47 = vmul.f32 %v571_v41, %v562_v43  ;;  %v574_v48 = vmul.f32 %v567_v40, %v561_v46 }
 0x2fe   : > { %v588_v49 = vadd.f32 %v584_v45, %v575_v47  ;;  %v587_v50 = vadd.f32 %v580_v44, %v574_v48  ;;  %v2432_v47 = vld [vmem:[#allocation11 + $0x4] ss:$8 sps:$4 sm:$0xff]   ;;  %v2454_v48 = vld [vmem:[#allocation11 + $0x80] ss:$8 sps:$4 sm:$0xff]  }
 0x300   : > { %v590_v51 = vpack.c.bf16 %v588_v49, %v588_v49  ;;  %v589_v52 = vpack.c.bf16 %v587_v50, %v587_v50  ;;  %v2456_v49 = vld [vmem:[#allocation11 + $0x84] ss:$8 sps:$4 sm:$0xff]   ;;  %v2459_v50 = vld [vmem:[#allocation11 + $0x94] ss:$8 sps:$4 sm:$0xff]  }
 0x301   : > { %1384 = vmatprep.subr.bf16.mxu0 %v2456_v49  ;;  %v2489_v49 = vld [vmem:[#allocation13 + $0x34] ss:$8 sps:$4 sm:$0xff]  }
 0x302   : > { %1011 = vmatprep.mubr.bf16.mxu1 %v590_v51  ;;  %1052 = vmatprep.mubr.bf16.mxu0 %v590_v51  ;;  %v2457_v51 = vld [vmem:[#allocation11 + $0x90] ss:$8 sps:$4 sm:$0xff]  }
 0x303   : > { %1012 = vmatmul.mubr.bf16.vlgmr.msra.gmra.mrb[4].mxu1 %v589_v52  ;;  %1053 = vmatmul.mubr.bf16.vlgmr.msra.gmra.mrb[0].mxu0 %v589_v52  ;;  %v2462_v52 = vld [vmem:[#allocation11 + $0xa4] ss:$8 sps:$4 sm:$0xff]  }
 0x304   : > { %1416 = vmatprep.mubr.bf16.mxu0 %v2827_v0  ;;  %2173 = vmatprep.mubr.msk.bf16.mxu1 %vm2829_vm0, %v2828_v53 }
 0x305   : > { %1385 = vmatpush1.bf16.msra.mxu0 %v2454_v48  ;;  %v2484_v48 = vld [vmem:[#allocation13 + $0x20] ss:$8 sps:$4 sm:$0xff]  }
 0x306   : > { %1386 = vmatprep.subr.bf16.mxu0 %v2459_v50  ;;  %v2487_v50 = vld [vmem:[#allocation13 + $0x30] ss:$8 sps:$4 sm:$0xff]  }
 0x309   : > { %1387 = vmatpush1.bf16.msra.mxu0 %v2457_v51  ;;  %v2492_v51 = vld [vmem:[#allocation13 + $0x44] ss:$8 sps:$4 sm:$0xff]  }
 0x30a   : > { %1388 = vmatprep.subr.bf16.mxu0 %v2462_v52  ;;  %v2490_v52 = vld [vmem:[#allocation13 + $0x40] ss:$8 sps:$4 sm:$0xff]  }
 0x3d6   : > { %v1013_v56 = vpop.f32.mrb[4].mxu1  ;;  %v1054_v57 = vpop.f32.mrb[0].mxu0 }
 0x3d7   : > { %v1014_v58 = vadd.f32 %v1013_v56, %v655_v54  ;;  %v1015_v60 = vpop.f32.mrb[5].mxu1  ;;  %v1056_v61 = vpop.f32.mrb[1].mxu0  ;;  %v1055_v5 = vadd.f32 %v1054_v57, %v657_v59  ;;  %v2465_v54 = vld [vmem:[#allocation11 + $0xb4] ss:$8 sps:$4 sm:$0xff]   ;;  %v2468_v56 = vld [vmem:[#allocation11 + $0xc4] ss:$8 sps:$4 sm:$0xff]  }
 0x3d8   : > { %v1057_v62 = vadd.f32 %v1056_v61, %v658_v55  ;;  %v1017_v63 = vpop.f32.mrb[6].mxu1  ;;  %v1058_v1 = vpop.f32.mrb[2].mxu0  ;;  %v1016_v25 = vadd.f32 %v1015_v60, %v656_v23  ;;  %v2463_v55 = vld [vmem:[#allocation11 + $0xb0] ss:$8 sps:$4 sm:$0xff]   ;;  %v2466_v57 = vld [vmem:[#allocation11 + $0xc0] ss:$8 sps:$4 sm:$0xff]  }
 0x3d9   : > { %v1061_v2 = vpack.c.bf16 %v1014_v58, %v1014_v58  ;;  %v1018_v3 = vpop.f32.mrb[7].mxu1  ;;  %v1059_v4 = vpop.f32.mrb[3].mxu0  ;;  %v1063_v8 = vpack.c.bf16 %v1055_v5, %v1055_v5  ;;  %v2471_v58 = vld [vmem:[#allocation11 + $0xd4] ss:$8 sps:$4 sm:$0xff]   ;;  %v2469_v59 = vld [vmem:[#allocation11 + $0xd0] ss:$8 sps:$4 sm:$0xff]  }
 0x3da   : > { %v1064_v6 = vpack.c.bf16 %v1057_v62, %v1057_v62  ;;  %v1062_v28 = vpack.c.bf16 %v1016_v25, %v1016_v25  ;;  %v2474_v60 = vld [vmem:[#allocation11 + $0xe4] ss:$8 sps:$4 sm:$0xff]   ;;  %v2472_v61 = vld [vmem:[#allocation11 + $0xe0] ss:$8 sps:$4 sm:$0xff]   ;;  %v2477_v62 = vld [vmem:[#allocation11 + $0xf4] ss:$8 sps:$4 sm:$0xff]  }
 0x3db   : > { %2172 = vmatpush3.bf16.xpose.msra.mxu1 %v1061_v2  ;;  %v1125_v10 = vsel %vm1123_vm1, %v1063_v8, 0  ;;  %v2475_v63 = vld [vmem:[#allocation11 + $0xf0] ss:$8 sps:$4 sm:$0xff]   ;;  %v2430_v4 = vld [vmem:[#allocation11] ss:$8 sps:$4 sm:$0xff]  }
 0x3dc   : > { %v1245_v7 = vsel %vm1123_vm1, %v1064_v6, 0  ;;  %2177 = vmatprep.subr.bf16.mxu1 %v2828_v53  ;;  %v2435_v6 = vld [vmem:[#allocation11 + $0x14] ss:$8 sps:$4 sm:$0xff]   ;;  %v2438_v8 = vld [vmem:[#allocation11 + $0x24] ss:$8 sps:$4 sm:$0xff]  }
 0x3e2   : > { %2174 = vmatmul.mubr.bf16.vlgmr.msra.gmra.mrb[8].mxu1 %v1065_v9  ;;  %v2436_v9 = vld [vmem:[#allocation11 + $0x20] ss:$8 sps:$4 sm:$0xff]  }
 0x3e3   : > { %2178 = vmatpush3.bf16.msra.mxu1 %v1125_v10  ;;  %2179 = vmatprep.mubr.msk.bf16.mxu1 %vm2829_vm0, %v2828_v53  ;;  %v2441_v10 = vld [vmem:[#allocation11 + $0x34] ss:$8 sps:$4 sm:$0xff]  }
 0x3e4   : > { %2183 = vmatprep.subr.bf16.mxu1 %v2828_v53 }
 0x4b5   : > { %v1100_v11 = vpop.f32.mrb[8].mxu1 }
 0x4b6   : > { %v1106_v12 = vmul.f32 0.088388346, %v1100_v11  ;;  %v2175_v13 = vpop.f32.mrb[9].mxu1  ;;  %v2439_v11 = vld [vmem:[#allocation11 + $0x30] ss:$8 sps:$4 sm:$0xff]  }
 0x4b7   : > { %v1103_v14 = vpop.f32.mrb[10].mxu1  ;;  %v2442_v13 = vld [vmem:[#allocation11 + $0x40] ss:$8 sps:$4 sm:$0xff]  }
 0x4b8   : > { %v2176_v15 = vpop.f32.mrb[11].mxu1  ;;  %v1108_v16 = vsel %vm1107_vm2, %v1106_v12, -inf  ;;  %v2447_v14 = vld [vmem:[#allocation11 + $0x54] ss:$8 sps:$4 sm:$0xff]  }
 0x4b9   : > { %1109 = vmax.xlane.f32.xlu1 %v1108_v16  ;;  %v2445_v15 = vld [vmem:[#allocation11 + $0x50] ss:$8 sps:$4 sm:$0xff]   ;;  %v2450_v16 = vld [vmem:[#allocation11 + $0x64] ss:$8 sps:$4 sm:$0xff]  }
 0x546   : > { %v1110_v17 = vpop.xlane.xlu1 %1109 }
 0x547   : > { %v1111_v18 = vsub.f32 %v1106_v12, %v1110_v17  ;;  %v2444_v12 = vld [vmem:[#allocation11 + $0x44] ss:$8 sps:$4 sm:$0xff]   ;;  %v2453_v17 = vld [vmem:[#allocation11 + $0x74] ss:$8 sps:$4 sm:$0xff]  }
 0x549   : > { %v1112_v19 = vmul.f32 1.442695, %v1111_v18  ;;  %v2451_v18 = vld [vmem:[#allocation11 + $0x70] ss:$8 sps:$4 sm:$0xff]  }
 0x54b   : > { %2528 = vpow2.f32 %v1112_v19 }
 0x555   : > { %v2529_v20 = vpop.eup %2528 }
 0x556   : > { %v1114_v21 = vsel %vm1107_vm2, %v2529_v20, 0.0 }
 0x557   : > { %1115 = vadd.xlane.f32.xlu1 %v1114_v21 }
 0x5e4   : > { %v1116_v22 = vpop.xlane.xlu1 %1115 }
 0x5e5   : > { %2530 = vrcp.f32 %v1116_v22 }
 0x5ef   : > { %v2531_v24 = vpop.eup %2530 }
 0x5f0   : > { %v1118_v26 = vmul.f32 %v2531_v24, %v2529_v20 }
 0x5f2   : > { %v1119_v27 = vpack.c.bf16 %v1118_v26, %v1118_v26 }
 0x5f4   : > { %2180 = vmatmul.mubr.msk.bf16.vlgmr.msra.gmra.mrb[12].mxu1 %vm1107_vm2, %v1119_v27 }
 0x5f5   : > { %2184 = vmatpush3.bf16.xpose.msra.mxu1 %v1062_v28  ;;  %2185 = vmatprep.mubr.msk.bf16.mxu1 %vm2829_vm0, %v2828_v53 }
 0x5f6   : > { %2189 = vmatprep.subr.bf16.mxu1 %v2828_v53 }
 0x5fc   : > { %2186 = vmatmul.mubr.bf16.vlgmr.msra.gmra.mrb[16].mxu1 %v2088_v29  ;;  %v2122_v29 = vld [vmem:[%s3276_s7 + $0x2] ss:$8 sm:$0x3] }
 0x5fd   : > { %2190 = vmatpush3.bf16.msra.mxu1 %v1245_v7  ;;  %2191 = vmatprep.mubr.msk.bf16.mxu1 %vm2829_vm0, %v2828_v53  ;;  %v2460_v53 = vld [vmem:[#allocation11 + $0xa0] ss:$8 sps:$4 sm:$0xff]   ;;  %v2433_v7 = vld [vmem:[#allocation11 + $0x10] ss:$8 sps:$4 sm:$0xff]  }
 0x5fe   : > { %1505 = vmatprep.subr.bf16.mxu1 %v2432_v47  ;;  %1389 = vmatpush1.bf16.msra.mxu0 %v2460_v53  ;;  %v2486_v47 = vld [vmem:[#allocation13 + $0x24] ss:$8 sps:$4 sm:$0xff]   ;;  %v2495_v53 = vld [vmem:[#allocation13 + $0x54] ss:$8 sps:$4 sm:$0xff]  }
 0x5ff   : > { %1390 = vmatprep.subr.bf16.mxu0 %v2465_v54  ;;  %v2493_v54 = vld [vmem:[#allocation13 + $0x50] ss:$8 sps:$4 sm:$0xff]  }
 0x602   : > { %1391 = vmatpush1.bf16.msra.mxu0 %v2463_v55  ;;  %v2498_v55 = vld [vmem:[#allocation13 + $0x64] ss:$8 sps:$4 sm:$0xff]  }
 0x603   : > { %1392 = vmatprep.subr.bf16.mxu0 %v2468_v56  ;;  %v2496_v56 = vld [vmem:[#allocation13 + $0x60] ss:$8 sps:$4 sm:$0xff]  }
 0x606   : > { %1393 = vmatpush1.bf16.msra.mxu0 %v2466_v57  ;;  %v2501_v57 = vld [vmem:[#allocation13 + $0x74] ss:$8 sps:$4 sm:$0xff]  }
 0x607   : > { %1394 = vmatprep.subr.bf16.mxu0 %v2471_v58  ;;  %v2499_v58 = vld [vmem:[#allocation13 + $0x70] ss:$8 sps:$4 sm:$0xff]  }
 0x60a   : > { %1395 = vmatpush1.bf16.msra.mxu0 %v2469_v59  ;;  %v2504_v59 = vld [vmem:[#allocation13 + $0x84] ss:$8 sps:$4 sm:$0xff]  }
 0x60b   : > { %1396 = vmatprep.subr.bf16.mxu0 %v2474_v60  ;;  %v2502_v60 = vld [vmem:[#allocation13 + $0x80] ss:$8 sps:$4 sm:$0xff]  }
 0x60e   : > { %1397 = vmatpush1.bf16.msra.mxu0 %v2472_v61  ;;  %v2507_v61 = vld [vmem:[#allocation13 + $0x94] ss:$8 sps:$4 sm:$0xff]  }
 0x60f   : > { %1398 = vmatprep.subr.bf16.mxu0 %v2477_v62  ;;  %v2505_v62 = vld [vmem:[#allocation13 + $0x90] ss:$8 sps:$4 sm:$0xff]  }
 0x612   : > { %1399 = vmatpush1.bf16.msra.mxu0 %v2475_v63 }
 0x6c7   : > { %v3197_v30 = vpop.f32.mrb[12].mxu1 }
 0x6c8   : > { %v2181_v31 = vpop.f32.mrb[13].mxu1  ;;  %v1167_v19 = vpack.c.bf16 %v3197_v30, %v3197_v30  ;;  %v1556_v30 = vrot.slane %v2122_v29, %v3175_v37 }
 0x6c9   : > { %v1164_v32 = vpop.f32.mrb[14].mxu1  ;;  %v1552_v31 = vrot.slane %v2122_v29, %v3173_v36 }
 0x6ca   : > { %v2182_v33 = vpop.f32.mrb[15].mxu1 }
 0x6cf   : > { %v1222_v34 = vpop.f32.mrb[16].mxu1 }
 0x6d0   : > { %v1228_v35 = vmul.f32 0.088388346, %v1222_v34  ;;  %v2187_v38 = vpop.f32.mrb[17].mxu1 }
 0x6d1   : > { %v1225_v39 = vpop.f32.mrb[18].mxu1 }
 0x6d2   : > { %v2188_v40 = vpop.f32.mrb[19].mxu1  ;;  %v1229_v41 = vsel %vm1107_vm2, %v1228_v35, -inf }
 0x6d3   : > { %1230 = vmax.xlane.f32.xlu0 %v1229_v41 }
 0x760   : > { %v1231_v42 = vpop.xlane.xlu0 %1230 }
 0x761   : > { %v1232_v43 = vsub.f32 %v1228_v35, %v1231_v42 }
 0x763   : > { %v1233_v44 = vmul.f32 1.442695, %v1232_v43  ;;  %v2478_v43 = vld [vmem:[#allocation13] ss:$8 sps:$4 sm:$0xff]  }
 0x765   : > { %2532 = vpow2.f32 %v1233_v44  ;;  %v2480_v44 = vld [vmem:[#allocation13 + $0x4] ss:$8 sps:$4 sm:$0xff]  }
 0x766   : > { %1801 = vmatprep.subr.bf16.mxu0 %v2480_v44 }
 0x76f   : > { %v2533_v45 = vpop.eup %2532 }
 0x770   : > { %v1235_v46 = vsel %vm1107_vm2, %v2533_v45, 0.0 }
 0x771   : > { %1236 = vadd.xlane.f32.xlu1 %v1235_v46  ;;  %v2481_v46 = vld [vmem:[#allocation13 + $0x10] ss:$8 sps:$4 sm:$0xff]  }
 0x7fe   : > { %v1237_v1 = vpop.xlane.xlu1 %1236 }
 0x7ff   : > { %2534 = vrcp.f32 %v1237_v1 }
 0x809   : > { %v2535_v2 = vpop.eup %2534 }
 0x80a   : > { %v1239_v3 = vmul.f32 %v2535_v2, %v2533_v45  ;;  %v2483_v45 = vld [vmem:[#allocation13 + $0x14] ss:$8 sps:$4 sm:$0xff]  }
 0x80c   : > { %v1240_v5 = vpack.c.bf16 %v1239_v3, %v1239_v3 }
 0x80e   : > { %2192 = vmatmul.mubr.msk.bf16.vlgmr.msra.gmra.mrb[20].mxu1 %vm1107_vm2, %v1240_v5 }
 0x80f   : > { %1506 = vmatpush1.bf16.msra.mxu1 %v2430_v4  ;;  %1537 = vmatprep.mubr.bf16.mxu1 %v2827_v0  ;;  %v2448_v0 = vld [vmem:[#allocation11 + $0x60] ss:$8 sps:$4 sm:$0xff]  }
 0x810   : > { %1507 = vmatprep.subr.bf16.mxu1 %v2435_v6 }
 0x813   : > { %1508 = vmatpush1.bf16.msra.mxu1 %v2433_v7  ;;  %v2510_v7 = vld [vmem:[#allocation13 + $0xa4] ss:$8 sps:$4 sm:$0xff]  }
 0x814   : > { %1509 = vmatprep.subr.bf16.mxu1 %v2438_v8  ;;  %v2508_v8 = vld [vmem:[#allocation13 + $0xa0] ss:$8 sps:$4 sm:$0xff]  }
 0x817   : > { %1510 = vmatpush1.bf16.msra.mxu1 %v2436_v9  ;;  %v2513_v9 = vld [vmem:[#allocation13 + $0xb4] ss:$8 sps:$4 sm:$0xff]  }
 0x818   : > { %1511 = vmatprep.subr.bf16.mxu1 %v2441_v10  ;;  %v2511_v10 = vld [vmem:[#allocation13 + $0xb0] ss:$8 sps:$4 sm:$0xff]  }
 0x81b   : > { %1512 = vmatpush1.bf16.msra.mxu1 %v2439_v11  ;;  %v2516_v11 = vld [vmem:[#allocation13 + $0xc4] ss:$8 sps:$4 sm:$0xff]  }
 0x81c   : > { %1513 = vmatprep.subr.bf16.mxu1 %v2444_v12  ;;  %v2514_v12 = vld [vmem:[#allocation13 + $0xc0] ss:$8 sps:$4 sm:$0xff]  }
 0x81f   : > { %1514 = vmatpush1.bf16.msra.mxu1 %v2442_v13  ;;  %v2519_v13 = vld [vmem:[#allocation13 + $0xd4] ss:$8 sps:$4 sm:$0xff]  }
 0x820   : > { %1515 = vmatprep.subr.bf16.mxu1 %v2447_v14  ;;  %v2517_v14 = vld [vmem:[#allocation13 + $0xd0] ss:$8 sps:$4 sm:$0xff]  }
 0x823   : > { %1516 = vmatpush1.bf16.msra.mxu1 %v2445_v15  ;;  %v2520_v15 = vld [vmem:[#allocation13 + $0xe0] ss:$8 sps:$4 sm:$0xff]  }
 0x824   : > { %1517 = vmatprep.subr.bf16.mxu1 %v2450_v16  ;;  %v2522_v16 = vld [vmem:[#allocation13 + $0xe4] ss:$8 sps:$4 sm:$0xff]  }
 0x827   : > { %1518 = vmatpush1.bf16.msra.mxu1 %v2448_v0  ;;  %v2525_v0 = vld [vmem:[#allocation13 + $0xf4] ss:$8 sps:$4 sm:$0xff]  }
 0x828   : > { %1519 = vmatprep.subr.bf16.mxu1 %v2453_v17  ;;  %v2523_v17 = vld [vmem:[#allocation13 + $0xf0] ss:$8 sps:$4 sm:$0xff]  }
 0x82b   : > { %1520 = vmatpush1.bf16.msra.mxu1 %v2451_v18 }
 0x82e   : > { %1538 = vmatmul.mubr.bf16.vlgmr.msra.gmra.mrb[24].mxu1 %v1167_v19 }
 0x8e1   : > { %v1281_v20 = vpop.f32.mrb[20].mxu1 }
 0x8e2   : > { %v1287_v21 = vpack.c.bf16 %v1281_v20, %v1281_v20  ;;  %v2193_v22 = vpop.f32.mrb[21].mxu1 }
 0x8e3   : > { %v1284_v23 = vpop.f32.mrb[22].mxu1  ;;  %v2124_v22 = vld [vmem:[%s3276_s7 + $0x4] ss:$8 sm:$0x3] }
 0x8e4   : > { %v2194_v24 = vpop.f32.mrb[23].mxu1  ;;  %1417 = vmatmul.mubr.bf16.vlgmr.msra.gmra.mrb[4].mxu0 %v1287_v21  ;;  %v2123_v21 = vld [vmem:[%s3276_s7 + $0x3] ss:$8 sm:$0x3]  ;;  %v1602_v29 = vrot.slane %v2124_v22, %v3175_v37 }
 0x8e5   : > { %1802 = vmatpush1.bf16.msra.mxu0 %v2478_v43  ;;  %v1585_v23 = vrot.slane %v2123_v21, %v3173_v36  ;;  %v1589_v24 = vrot.slane %v2123_v21, %v3175_v37 }
 0x8e6   : > { %1803 = vmatprep.subr.bf16.mxu0 %v2483_v45 }
 0x8e9   : > { %1804 = vmatpush1.bf16.msra.mxu0 %v2481_v46 }
 0x8ea   : > { %1805 = vmatprep.subr.bf16.mxu0 %v2486_v47 }
 0x8ed   : > { %1806 = vmatpush1.bf16.msra.mxu0 %v2484_v48 }
 0x8ee   : > { %1807 = vmatprep.subr.bf16.mxu0 %v2489_v49 }
 0x8f1   : > { %1808 = vmatpush1.bf16.msra.mxu0 %v2487_v50 }
 0x8f2   : > { %1809 = vmatprep.subr.bf16.mxu0 %v2492_v51 }
 0x8f5   : > { %1810 = vmatpush1.bf16.msra.mxu0 %v2490_v52 }
 0x8f6   : > { %1811 = vmatprep.subr.bf16.mxu0 %v2495_v53 }
 0x8f9   : > { %1812 = vmatpush1.bf16.msra.mxu0 %v2493_v54 }
 0x8fa   : > { %1813 = vmatprep.subr.bf16.mxu0 %v2498_v55 }
 0x8fd   : > { %1814 = vmatpush1.bf16.msra.mxu0 %v2496_v56 }
 0x8fe   : > { %1815 = vmatprep.subr.bf16.mxu0 %v2501_v57 }
 0x901   : > { %v1539_v25 = vpop.f32.mrb[24].mxu1  ;;  %1816 = vmatpush1.bf16.msra.mxu0 %v2499_v58 }
 0x902   : > { %v1541_v26 = vpop.f32.mrb[25].mxu1  ;;  %1817 = vmatprep.subr.bf16.mxu0 %v2504_v59 }
 0x903   : > { %v1543_v27 = vpop.f32.mrb[26].mxu1 }
 0x904   : > { %v1544_v28 = vpop.f32.mrb[27].mxu1 }
 0x905   : > { %1818 = vmatpush1.bf16.msra.mxu0 %v2502_v60  ;;  %v1598_v28 = vrot.slane %v2124_v22, %v3173_v36 }
 0x906   : > { %1819 = vmatprep.subr.bf16.mxu0 %v2507_v61 }
 0x909   : > { %1820 = vmatpush1.bf16.msra.mxu0 %v2505_v62 }
 0x90a   : > { %1821 = vmatprep.subr.bf16.mxu0 %v2510_v7 }
 0x90d   : > { %1822 = vmatpush1.bf16.msra.mxu0 %v2508_v8 }
 0x90e   : > { %1823 = vmatprep.subr.bf16.mxu0 %v2513_v9 }
 0x911   : > { %1824 = vmatpush1.bf16.msra.mxu0 %v2511_v10 }
 0x912   : > { %1825 = vmatprep.subr.bf16.mxu0 %v2516_v11 }
 0x915   : > { %1826 = vmatpush1.bf16.msra.mxu0 %v2514_v12 }
 0x916   : > { %1827 = vmatprep.subr.bf16.mxu0 %v2519_v13 }
 0x919   : > { %1828 = vmatpush1.bf16.msra.mxu0 %v2517_v14 }
 0x91a   : > { %1829 = vmatprep.subr.bf16.mxu0 %v2522_v16 }
 0x91d   : > { %1830 = vmatpush1.bf16.msra.mxu0 %v2520_v15 }
 0x91e   : > { %1831 = vmatprep.subr.bf16.mxu0 %v2525_v0 }
 0x921   : > { %1832 = vmatpush1.bf16.msra.mxu0 %v2523_v17 }
 0x9b7   : > { %v1418_v32 = vpop.f32.mrb[4].mxu0 }
 0x9b8   : > { %v1540_v33 = vadd.f32 %v1539_v25, %v1418_v32  ;;  %v1420_v34 = vpop.f32.mrb[5].mxu0 }
 0x9b9   : > { %v1542_v35 = vadd.f32 %v1541_v26, %v1420_v34  ;;  %v1422_v38 = vpop.f32.mrb[6].mxu0 }
 0x9ba   : > { %v1559_v39 = vadd.f32 %v1552_v31, %v1540_v33  ;;  %v1423_v40 = vpop.f32.mrb[7].mxu0 }
 0x9bb   : > { %v1560_v41 = vadd.f32 %v1556_v30, %v1542_v35 }
 0x9bd   : > { %v1565_v42 = vadd.f32 %v1560_v41, %v1559_v39 }
 0x9bf   : > { %1566 = vadd.xlane.f32.xlu0 %v1565_v42 }
 0xa4c   : > { %v1567_v63 = vpop.xlane.xlu0 %1566 }
 0xa4d   : > { %v1568_v1 = vmul.f32 0.00390625, %v1567_v63 }
 0xa4f   : > { %v1569_v2 = vsub.f32 %v1559_v39, %v1568_v1  ;;  %v1570_v3 = vsub.f32 %v1560_v41, %v1568_v1 }
 0xa51   : > { %v1571_v4 = vmul.f32 %v1569_v2, %v1569_v2  ;;  %v1572_v5 = vmul.f32 %v1570_v3, %v1570_v3 }
 0xa53   : > { %v1573_v6 = vadd.f32 %v1572_v5, %v1571_v4 }
 0xa55   : > { %1574 = vadd.xlane.f32.xlu1 %v1573_v6 }
 0xae2   : > { %v1575_v18 = vpop.xlane.xlu1 %1574 }
 0xae3   : > { %v1576_v19 = vmul.f32 0.00390625, %v1575_v18 }
 0xae5   : > { %v1577_v20 = vadd.f32 1e-06, %v1576_v19 }
 0xae7   : > { %2536 = vrsqrt.f32 %v1577_v20 }
 0xaf1   : > { %v2537_v25 = vpop.eup %2536 }
 0xaf2   : > { %v1579_v26 = vmul.f32 %v2537_v25, %v1569_v2  ;;  %v1580_v27 = vmul.f32 %v2537_v25, %v1570_v3 }
 0xaf4   : > { %v1593_v31 = vmul.f32 %v1589_v24, %v1580_v27  ;;  %v1592_v32 = vmul.f32 %v1585_v23, %v1579_v26 }
 0xaf6   : > { %v1606_v30 = vadd.f32 %v1602_v29, %v1593_v31  ;;  %v1605_v33 = vadd.f32 %v1598_v28, %v1592_v32 }
 0xaf8   : > { %v1608_v34 = vpack.c.bf16 %v1606_v30, %v1606_v30  ;;  %v1607_v35 = vpack.c.bf16 %v1605_v33, %v1605_v33 }
 0xafa   : > { %1833 = vmatprep.mubr.bf16.mxu0 %v1608_v34 }
 0xafb   : > { %1834 = vmatmul.mubr.bf16.vlgmr.msra.gmra.mrb[8].mxu0 %v1607_v35 }
 0xbce   : > { %v1835_v36 = vpop.f32.mrb[8].mxu0 }
 0xbcf   : > { %1842 = vst [vmem:[%s403_s21] sm:$0xff] %v1835_v36  ;;  %v1837_v37 = vpop.f32.mrb[9].mxu0 }
 0xbd0   : > { %1843 = vst [vmem:[%s403_s21 + $0x8] sm:$0xff] %v1837_v37  ;;  %v1839_v38 = vpop.f32.mrb[10].mxu0 }
 0xbd1   : > { %v1840_v39 = vpop.f32.mrb[11].mxu0 }
 0xbd2   : > { %2749 = shalt.err (!%p2746_p3)
}
 0xbd3   : > { %s2750_s16 = scalar_lea.hbm %s3227_s20, 256  ;;  %s2754_s10 = scalar_lea.hbm %s3277_s8, 512 }
 0xbd4   : > { %p2751_p7 = scmp.ne.s32.totalorder %s3227_s20, %s2750_s16  ;;  %p2755_p8 = scmp.lt.u32.totalorder %s3227_s20, %s3277_s8 }
 0xbd5   : > { %p2756_p0 = scmp.lt.u32.totalorder %s2754_s10, %s2750_s16  ;;  %p2758_p6 = scmp.lt.u32.totalorder %s2750_s16, %s3227_s20 }
 0xbd6   : > { %p2752_p9 = pnand %p2751_p7, %p3302_p5 }
 0xbd7   : > { %p2757_p2 = por %p2756_p0, %p2755_p8 }
 0xbd8   : > { %p2753_p4 = pneg %p2752_p9 }
 0xbd9   : > { %p2759_p10 = por %p2758_p6, %p2757_p2 }
 0xbdb   : > { %p2760_p1 = pnand %p2759_p10, %p2753_p4 }
 0xbdd   : > { %2763 = shalt.err (!%p2760_p1)
}
 0xbde   : > { %2221 = dma.vmem_to_hbm [thread:$0]  (%p3302_p5), %s3222_s19, 256, %s3227_s20, %s1845_s15  }
 0xbdf PF: > { %s1871_s13 = sand.u32 1, %s2802_s27   ;;  %p3303_p11 = scmp.ne.s32.totalorder %s3293_s24, 0 }
 0xbe0   : > { %p3304_p12 = scmp.ge.s32.totalorder %s2814_s30, 2  ;;  %s1872_s22 = scalar_lea.sflag [#allocation4], %s1871_s13 }
 0xbe2   : > { %p2247_p13 = pnand %p3304_p12, %p3303_p11 }
 0xbe4   : > { %2797 = dma.done.wait (!%p2247_p13), %s1872_s22, 256  }
 0xbe5   : > { %2799 = vsyncadd (!%p2247_p13), %s1872_s22, 4294967040  ;;  %p24_p3 = scmp.ge.s32.totalorder %s3057_s23, 4   ;;  %s3305_s27 = smov %s2806_s28 }
 0xbe6   : > { %s3306_s28 = smov %s2810_s29  ;;  %s3307_s29 = smov %s3068_s1 }
 0xbe7   : > { %s3308_s30 = smov %s3057_s23  ;;  %26 = sbr.rel (!%p24_p3) target bundleno = 10 (0xa), region = 125 }
 0xbee   :  { %1877 = vsyncpa [#allocation3], 1 }
 0xbef   :  { %1879 = vsyncpa [#allocation3 + $0x1], 1 }
 0xbf0   :  { %1880 = vsyncpa [#allocation6], 1 }
 0xbf1   :  { %1881 = vsyncpa [#allocation9], 1 }
 0xbf2   :  { %1882 = vsyncpa [#allocation12], 1 }
 0xbf3   :  { %1883 = vsyncpa [#allocation4], 1 }
 0xbf4   :  { %1885 = vsyncpa [#allocation4 + $0x1], 1 }

</bundles_post_ra>
